<compile_context>
chip_gen: v5e
topology: v5e:2x2
jax: 0.10.0
libtpu: 0.0.40
codegen_flags: <defaults>
</compile_context>

<pallas_src>
import functools
import math

import jax
import jax.numpy as jnp
from jax.experimental import pallas as pl
from jax.experimental.pallas import tpu as pltpu

VMEM = pl.BlockSpec(memory_space=pltpu.MemorySpace.VMEM)
SMEM = pl.BlockSpec(memory_space=pltpu.MemorySpace.SMEM)

_BN_EPS = 1e-5


# ----------------------------- in-kernel helpers ---------------------------- #

def _mxu(a, b):
    """MXU matmul with f32 accumulation (operands already in their final dtype)."""
    return jnp.dot(a, b, preferred_element_type=jnp.float32)


def _batchnorm(x, gamma, beta, *, relu=False):
    """Training-mode BatchNorm1d, single-pass statistics, values stay in vregs."""
    mean = jnp.mean(x, axis=0, keepdims=True)
    var = jnp.maximum(jnp.mean(x * x, axis=0, keepdims=True) - mean * mean, 0.0)
    y = (x - mean) * (jax.lax.rsqrt(var + _BN_EPS) * gamma) + beta
    if relu:
        y = jnp.maximum(y, 0.0)
    return y


# ------------------------------- fused kernel ------------------------------- #

def _bv_forward_kernel(*refs, n_layers, c):
    (t_ref, x_ref, ea_ref, s_ref, at_ref, pool_ref,
     new_ref, eew_ref,
     bng_ref, bnb_ref, beg_ref, beb_ref,
     fcw_ref, fcb_ref) = refs[:14]
    layer_refs = refs[14:14 + 5 * n_layers]
    o_ref = refs[-1]

    # node / edge encoders (QuantLinear ~ Linear; bias dropped: exact no-op
    # under training-mode BN) fused with bn_input BatchNorm.
    x = _batchnorm(_mxu(x_ref[...], new_ref[...]), bng_ref[...], bnb_ref[...])
    ea = _batchnorm(_mxu(ea_ref[...], eew_ref[...]), beg_ref[...], beb_ref[...])

    S = s_ref[...]     # (E, N) bf16 one-hot of source node per edge (exact)
    AT = at_ref[...]   # (N, E) f32 transposed one-hot of destination per edge

    for i in range(n_layers):
        w1_ref, g_ref, bb_ref, w2_ref, b2_ref = layer_refs[5 * i:5 * i + 5]
        identity = x
        t = t_ref[i]                                   # learned temperature (SMEM scalar)

        # --- GENConv (softmax aggregation); gather as bf16 MXU matmul -------
        x_src = _mxu(S, x.astype(jnp.bfloat16))        # gather x[src]   (E, C)
        msg = jnp.maximum(x_src + ea, 0.0) + 1e-7      # relu(x_j + e_ij) + eps
        z = t * msg
        z = z - jnp.max(z, axis=0, keepdims=True)      # per-col stab; exact in the ratio
        ex = jnp.exp(z)                                # f32 (precision of softmax weights)
        # fused scatter: one (N,E)x(E,2C) f32 matmul gives [num | den]
        nd = _mxu(AT, jnp.concatenate([ex * msg, ex], axis=1))   # (N, 2C)
        num = nd[:, :c]
        den = jnp.maximum(nd[:, c:], 1e-12)            # isolated-node / underflow guard
        x = x + num * pl.reciprocal(den, approx=True)  # root (self) add

        # --- BV_MLP: Linear(C->2C) -> BN -> ReLU -> Linear(2C->C), residual --
        # first Linear bias dropped (BN-absorbed, exact no-op)
        h = _batchnorm(_mxu(x.astype(jnp.bfloat16), w1_ref[...]),
                       g_ref[...], bb_ref[...], relu=True)
        x = _mxu(h.astype(jnp.bfloat16), w2_ref[...]) + b2_ref[...] + identity

    # readout reordered (exact: fc_out and mean-pool are both linear):
    #   v = x @ fc_w  -> per-node scalar, then mean-pool -> (1, G), sigmoid.
    v = jnp.sum(x * fcw_ref[...], axis=1, keepdims=True)          # (N, 1)
    pooled = jnp.sum(pool_ref[...] * v, axis=0, keepdims=True)    # (1, G)
    o_ref[...] = jax.nn.sigmoid(pooled + fcb_ref[...])


# --------------------------------- wrapper ---------------------------------- #

def _vmem_limit_bytes(args, n_nodes, n_edges, c, n_graphs):
    """Size the VMEM limit from actual resident bytes (v7x has 64 MiB/TC)."""
    arg_bytes = sum(math.prod(a.shape) * a.dtype.itemsize for a in args)
    act_bytes = 4 * (n_edges * 2 * c + n_nodes * 2 * c + n_nodes * n_graphs) * 4
    need = 2 * arg_bytes + 4 * act_bytes + (1 << 20)
    return int(min(100 * (1 << 20), max(4 * (1 << 20), need)))


def bv_model_forward(params, x, edge_attr, src_onehot, dst_onehot_t, pool_nt,
                     n_layers):
    c = params["node_enc_w"].shape[1]
    n_graphs = pool_nt.shape[1]
    bf = lambda a: a.astype(jnp.bfloat16)   # pre-cast weights/inputs once, outside the kernel

    args = [
        params["t_all"],                                   # SMEM scalars
        bf(x), bf(edge_attr),
        src_onehot.astype(jnp.bfloat16),                   # one-hot: exact in bf16
        dst_onehot_t.astype(jnp.float32),                  # f32 so softmax scatter accumulates in f32
        pool_nt.astype(jnp.float32),
        bf(params["node_enc_w"]), bf(params["edge_enc_w"]),
        params["bn_node_g"], params["bn_node_b"],
        params["bn_edge_g"], params["bn_edge_b"],
        params["fc_w"], params["fc_b"],
    ]
    for i in range(n_layers):
        args += [bf(params[f"mlp{i}_w1"]),
                 params[f"mlp{i}_g"], params[f"mlp{i}_bb"],
                 bf(params[f"mlp{i}_w2"]), params[f"mlp{i}_b2"]]

    in_specs = [SMEM] + [VMEM] * (len(args) - 1)
    out = pl.pallas_call(
        functools.partial(_bv_forward_kernel, n_layers=n_layers, c=c),
        out_shape=jax.ShapeDtypeStruct((1, n_graphs), jnp.float32),
        in_specs=in_specs,
        out_specs=VMEM,
        compiler_params=pltpu.CompilerParams(
            vmem_limit_bytes=_vmem_limit_bytes(
                args, x.shape[0], edge_attr.shape[0], c, n_graphs)),
    )(*args)
    return out.reshape(n_graphs, 1)


# ------------------------------ parameter init ------------------------------ #

def init_params(key, x_dim, edge_dim, c, n_layers):
    def dense(k, shape):
        return (0.1 * jax.random.normal(k, shape)).astype(jnp.float32)

    keys = iter(jax.random.split(key, 4 + 3 * n_layers))
    p = {
        "node_enc_w": dense(next(keys), (x_dim, c)),
        "edge_enc_w": dense(next(keys), (edge_dim, c)),
        "bn_node_g": jnp.ones((1, c), jnp.float32),
        "bn_node_b": jnp.zeros((1, c), jnp.float32),
        "bn_edge_g": jnp.ones((1, c), jnp.float32),
        "bn_edge_b": jnp.zeros((1, c), jnp.float32),
        "fc_w": dense(next(keys), (1, c)),        # fc_out weight stored as a row
        "fc_b": dense(next(keys), (1, 1)),
        "t_all": jnp.ones((n_layers,), jnp.float32),      # learn_t init
    }
    # NOTE: node/edge encoder biases and the MLP first-Linear bias are omitted:
    # they are exactly cancelled by the training-mode BatchNorm that follows.
    for i in range(n_layers):
        p[f"mlp{i}_w1"] = dense(next(keys), (c, 2 * c))
        p[f"mlp{i}_g"] = jnp.ones((1, 2 * c), jnp.float32)
        p[f"mlp{i}_bb"] = jnp.zeros((1, 2 * c), jnp.float32)
        p[f"mlp{i}_w2"] = dense(next(keys), (2 * c, c))
        p[f"mlp{i}_b2"] = dense(next(keys), (1, c))
    return p


# ----------------------------------- main ----------------------------------- #

if __name__ == "__main__":
    X_DIM, EDGE_DIM, C, N_LAYERS = 6, 4, 32, 2
    N_NODES, N_EDGES_PER_G, N_GRAPHS = 16, 24, 2
    nodes_per_g = N_NODES // N_GRAPHS
    E = N_EDGES_PER_G * N_GRAPHS

    key = jax.random.PRNGKey(0)
    k_x, k_e, k_src, k_dst, k_par = jax.random.split(key, 5)

    x = jax.random.normal(k_x, (N_NODES, X_DIM), jnp.float32)
    edge_attr = jax.random.normal(k_e, (E, EDGE_DIM), jnp.float32)

    # per-graph edges (edge_index) and batch assignment
    src_local = jax.random.randint(k_src, (N_GRAPHS, N_EDGES_PER_G), 0, nodes_per_g)
    dst_local = jax.random.randint(k_dst, (N_GRAPHS, N_EDGES_PER_G), 0, nodes_per_g)
    offsets = (jnp.arange(N_GRAPHS) * nodes_per_g)[:, None]
    src = (src_local + offsets).reshape(-1)
    dst = (dst_local + offsets).reshape(-1)
    edge_index = jnp.stack([src, dst], axis=0)                      # (2, E)
    batch = jnp.repeat(jnp.arange(N_GRAPHS), nodes_per_g)           # (N,)

    # graph structure as dense operators (demo size); gather/scatter happen as
    # MXU matmuls inside the fused kernel.
    # TODO(synk): for large graphs switch to PrefetchScalarGridSpec index-based
    # gather/scatter (O(E*C)) plus an edge-tile grid instead of dense O(E*N).
    node_ids = jnp.arange(N_NODES)
    src_onehot = (edge_index[0][:, None] == node_ids[None, :]).astype(jnp.bfloat16)    # (E, N)
    dst_onehot_t = (node_ids[:, None] == edge_index[1][None, :]).astype(jnp.float32)   # (N, E)
    graph_onehot_nt = (batch[:, None] == jnp.arange(N_GRAPHS)[None, :]).astype(jnp.float32)
    pool_nt = graph_onehot_nt / jnp.sum(graph_onehot_nt, axis=0, keepdims=True)        # (N, G)

    params = init_params(k_par, X_DIM, EDGE_DIM, C, N_LAYERS)

    fwd = jax.jit(functools.partial(bv_model_forward, n_layers=N_LAYERS))
    out = fwd(params, x, edge_attr, src_onehot, dst_onehot_t, pool_nt)
    out = jax.block_until_ready(out)

    assert out.shape == (N_GRAPHS, 1)
    assert bool(jnp.all(jnp.isfinite(out)))
    assert bool(jnp.all((out >= 0.0) & (out <= 1.0)))   # sigmoid output
    print("KERNEL_OK")
</pallas_src>

<mosaic_0001>
module attributes {stable_mosaic.version = 11 : i64} {
  func.func @_bv_forward_kernel(%arg0: memref<2xf32, #tpu.memory_space<smem>>, %arg1: memref<16x6xbf16, #tpu.memory_space<vmem>>, %arg2: memref<48x4xbf16, #tpu.memory_space<vmem>>, %arg3: memref<48x16xbf16, #tpu.memory_space<vmem>>, %arg4: memref<16x48xf32, #tpu.memory_space<vmem>>, %arg5: memref<16x2xf32, #tpu.memory_space<vmem>>, %arg6: memref<6x32xbf16, #tpu.memory_space<vmem>>, %arg7: memref<4x32xbf16, #tpu.memory_space<vmem>>, %arg8: memref<1x32xf32, #tpu.memory_space<vmem>>, %arg9: memref<1x32xf32, #tpu.memory_space<vmem>>, %arg10: memref<1x32xf32, #tpu.memory_space<vmem>>, %arg11: memref<1x32xf32, #tpu.memory_space<vmem>>, %arg12: memref<1x32xf32, #tpu.memory_space<vmem>>, %arg13: memref<1x1xf32, #tpu.memory_space<vmem>>, %arg14: memref<32x64xbf16, #tpu.memory_space<vmem>>, %arg15: memref<1x64xf32, #tpu.memory_space<vmem>>, %arg16: memref<1x64xf32, #tpu.memory_space<vmem>>, %arg17: memref<64x32xbf16, #tpu.memory_space<vmem>>, %arg18: memref<1x32xf32, #tpu.memory_space<vmem>>, %arg19: memref<32x64xbf16, #tpu.memory_space<vmem>>, %arg20: memref<1x64xf32, #tpu.memory_space<vmem>>, %arg21: memref<1x64xf32, #tpu.memory_space<vmem>>, %arg22: memref<64x32xbf16, #tpu.memory_space<vmem>>, %arg23: memref<1x32xf32, #tpu.memory_space<vmem>>, %arg24: memref<1x2xf32, #tpu.memory_space<vmem>>) attributes {dimension_semantics = [], scalar_prefetch = 0 : i64, scratch_operands = 0 : i64, tpu.core_type = #tpu.core_type<tc>} {
    %c0 = arith.constant 0 : index
    %c0_0 = arith.constant 0 : index
    %0 = vector.load %arg1[%c0, %c0_0] : memref<16x6xbf16, #tpu.memory_space<vmem>>, vector<16x6xbf16>
    %c0_1 = arith.constant 0 : index
    %c0_2 = arith.constant 0 : index
    %1 = vector.load %arg6[%c0_1, %c0_2] : memref<6x32xbf16, #tpu.memory_space<vmem>>, vector<6x32xbf16>
    %cst = arith.constant dense<0.000000e+00> : vector<16x32xf32>
    %2 = tpu.matmul %0, %1, %cst {dimension_numbers = #tpu.dot_dimension_numbers<[1], [0], [0], [1], [0, 0, 1, 1], [], []>} : vector<16x6xbf16>, vector<6x32xbf16>, vector<16x32xf32> -> vector<16x32xf32>
    %c0_3 = arith.constant 0 : index
    %c0_4 = arith.constant 0 : index
    %3 = vector.load %arg8[%c0_3, %c0_4] : memref<1x32xf32, #tpu.memory_space<vmem>>, vector<1x32xf32>
    %c0_5 = arith.constant 0 : index
    %c0_6 = arith.constant 0 : index
    %4 = vector.load %arg9[%c0_5, %c0_6] : memref<1x32xf32, #tpu.memory_space<vmem>>, vector<1x32xf32>
    %cst_7 = arith.constant dense<0.000000e+00> : vector<32xf32>
    %5 = vector.multi_reduction <add>, %2, %cst_7 [0] : vector<16x32xf32> to vector<32xf32>
    %6 = vector.shape_cast %5 : vector<32xf32> to vector<1x32xf32>
    %cst_8 = arith.constant 1.600000e+01 : f32
    %7 = vector.broadcast %cst_8 : f32 to vector<1x32xf32>
    %8 = arith.divf %6, %7 : vector<1x32xf32>
    %9 = arith.mulf %2, %2 : vector<16x32xf32>
    %cst_9 = arith.constant dense<0.000000e+00> : vector<32xf32>
    %10 = vector.multi_reduction <add>, %9, %cst_9 [0] : vector<16x32xf32> to vector<32xf32>
    %11 = vector.shape_cast %10 : vector<32xf32> to vector<1x32xf32>
    %cst_10 = arith.constant 1.600000e+01 : f32
    %12 = vector.broadcast %cst_10 : f32 to vector<1x32xf32>
    %13 = arith.divf %11, %12 : vector<1x32xf32>
    %14 = arith.mulf %8, %8 : vector<1x32xf32>
    %15 = arith.subf %13, %14 : vector<1x32xf32>
    %cst_11 = arith.constant 0.000000e+00 : f32
    %16 = vector.broadcast %cst_11 : f32 to vector<1x32xf32>
    %17 = arith.maximumf %15, %16 : vector<1x32xf32>
    %18 = vector.broadcast %8 : vector<1x32xf32> to vector<16x32xf32>
    %19 = arith.subf %2, %18 : vector<16x32xf32>
    %cst_12 = arith.constant 9.99999974E-6 : f32
    %20 = vector.broadcast %cst_12 : f32 to vector<1x32xf32>
    %21 = arith.addf %17, %20 : vector<1x32xf32>
    %22 = math.rsqrt %21 : vector<1x32xf32>
    %23 = arith.mulf %22, %3 : vector<1x32xf32>
    %24 = vector.broadcast %23 : vector<1x32xf32> to vector<16x32xf32>
    %25 = arith.mulf %19, %24 : vector<16x32xf32>
    %26 = vector.broadcast %4 : vector<1x32xf32> to vector<16x32xf32>
    %27 = arith.addf %25, %26 : vector<16x32xf32>
    %c0_13 = arith.constant 0 : index
    %c0_14 = arith.constant 0 : index
    %28 = vector.load %arg2[%c0_13, %c0_14] : memref<48x4xbf16, #tpu.memory_space<vmem>>, vector<48x4xbf16>
    %c0_15 = arith.constant 0 : index
    %c0_16 = arith.constant 0 : index
    %29 = vector.load %arg7[%c0_15, %c0_16] : memref<4x32xbf16, #tpu.memory_space<vmem>>, vector<4x32xbf16>
    %cst_17 = arith.constant dense<0.000000e+00> : vector<48x32xf32>
    %30 = tpu.matmul %28, %29, %cst_17 {dimension_numbers = #tpu.dot_dimension_numbers<[1], [0], [0], [1], [0, 0, 1, 1], [], []>} : vector<48x4xbf16>, vector<4x32xbf16>, vector<48x32xf32> -> vector<48x32xf32>
    %c0_18 = arith.constant 0 : index
    %c0_19 = arith.constant 0 : index
    %31 = vector.load %arg10[%c0_18, %c0_19] : memref<1x32xf32, #tpu.memory_space<vmem>>, vector<1x32xf32>
    %c0_20 = arith.constant 0 : index
    %c0_21 = arith.constant 0 : index
    %32 = vector.load %arg11[%c0_20, %c0_21] : memref<1x32xf32, #tpu.memory_space<vmem>>, vector<1x32xf32>
    %cst_22 = arith.constant dense<0.000000e+00> : vector<32xf32>
    %33 = vector.multi_reduction <add>, %30, %cst_22 [0] : vector<48x32xf32> to vector<32xf32>
    %34 = vector.shape_cast %33 : vector<32xf32> to vector<1x32xf32>
    %cst_23 = arith.constant 4.800000e+01 : f32
    %35 = vector.broadcast %cst_23 : f32 to vector<1x32xf32>
    %36 = arith.divf %34, %35 : vector<1x32xf32>
    %37 = arith.mulf %30, %30 : vector<48x32xf32>
    %cst_24 = arith.constant dense<0.000000e+00> : vector<32xf32>
    %38 = vector.multi_reduction <add>, %37, %cst_24 [0] : vector<48x32xf32> to vector<32xf32>
    %39 = vector.shape_cast %38 : vector<32xf32> to vector<1x32xf32>
    %cst_25 = arith.constant 4.800000e+01 : f32
    %40 = vector.broadcast %cst_25 : f32 to vector<1x32xf32>
    %41 = arith.divf %39, %40 : vector<1x32xf32>
    %42 = arith.mulf %36, %36 : vector<1x32xf32>
    %43 = arith.subf %41, %42 : vector<1x32xf32>
    %cst_26 = arith.constant 0.000000e+00 : f32
    %44 = vector.broadcast %cst_26 : f32 to vector<1x32xf32>
    %45 = arith.maximumf %43, %44 : vector<1x32xf32>
    %46 = vector.broadcast %36 : vector<1x32xf32> to vector<48x32xf32>
    %47 = arith.subf %30, %46 : vector<48x32xf32>
    %cst_27 = arith.constant 9.99999974E-6 : f32
    %48 = vector.broadcast %cst_27 : f32 to vector<1x32xf32>
    %49 = arith.addf %45, %48 : vector<1x32xf32>
    %50 = math.rsqrt %49 : vector<1x32xf32>
    %51 = arith.mulf %50, %31 : vector<1x32xf32>
    %52 = vector.broadcast %51 : vector<1x32xf32> to vector<48x32xf32>
    %53 = arith.mulf %47, %52 : vector<48x32xf32>
    %54 = vector.broadcast %32 : vector<1x32xf32> to vector<48x32xf32>
    %55 = arith.addf %53, %54 : vector<48x32xf32>
    %c0_28 = arith.constant 0 : index
    %c0_29 = arith.constant 0 : index
    %56 = vector.load %arg3[%c0_28, %c0_29] : memref<48x16xbf16, #tpu.memory_space<vmem>>, vector<48x16xbf16>
    %c0_30 = arith.constant 0 : index
    %c0_31 = arith.constant 0 : index
    %57 = vector.load %arg4[%c0_30, %c0_31] : memref<16x48xf32, #tpu.memory_space<vmem>>, vector<16x48xf32>
    %c0_32 = arith.constant 0 : index
    %58 = memref.load %arg0[%c0_32] : memref<2xf32, #tpu.memory_space<smem>>
    %59 = arith.truncf %27 : vector<16x32xf32> to vector<16x32xbf16>
    %cst_33 = arith.constant dense<0.000000e+00> : vector<48x32xf32>
    %60 = tpu.matmul %56, %59, %cst_33 {dimension_numbers = #tpu.dot_dimension_numbers<[1], [0], [0], [1], [0, 0, 1, 1], [], []>} : vector<48x16xbf16>, vector<16x32xbf16>, vector<48x32xf32> -> vector<48x32xf32>
    %61 = arith.addf %60, %55 : vector<48x32xf32>
    %cst_34 = arith.constant 0.000000e+00 : f32
    %62 = vector.broadcast %cst_34 : f32 to vector<48x32xf32>
    %63 = arith.maximumf %61, %62 : vector<48x32xf32>
    %cst_35 = arith.constant 1.000000e-07 : f32
    %64 = vector.broadcast %cst_35 : f32 to vector<48x32xf32>
    %65 = arith.addf %63, %64 : vector<48x32xf32>
    %66 = vector.broadcast %58 : f32 to vector<48x32xf32>
    %67 = arith.mulf %66, %65 : vector<48x32xf32>
    %cst_36 = arith.constant dense<0xFF800000> : vector<32xf32>
    %68 = vector.multi_reduction <maximumf>, %67, %cst_36 [0] : vector<48x32xf32> to vector<32xf32>
    %69 = vector.shape_cast %68 : vector<32xf32> to vector<1x32xf32>
    %70 = vector.broadcast %69 : vector<1x32xf32> to vector<48x32xf32>
    %71 = arith.subf %67, %70 : vector<48x32xf32>
    %72 = math.exp %71 : vector<48x32xf32>
    %73 = arith.mulf %72, %65 : vector<48x32xf32>
    %74 = tpu.concatenate %73, %72 in 1 : vector<48x32xf32>, vector<48x32xf32> -> vector<48x64xf32>
    %cst_37 = arith.constant dense<0.000000e+00> : vector<16x64xf32>
    %75 = tpu.matmul %57, %74, %cst_37 {dimension_numbers = #tpu.dot_dimension_numbers<[1], [0], [0], [1], [0, 0, 1, 1], [], []>} : vector<16x48xf32>, vector<48x64xf32>, vector<16x64xf32> -> vector<16x64xf32>
    %76 = vector.extract_strided_slice %75 {offsets = [0, 0], sizes = [16, 32], strides = [1, 1]} : vector<16x64xf32> to vector<16x32xf32>
    %77 = vector.extract_strided_slice %75 {offsets = [0, 32], sizes = [16, 32], strides = [1, 1]} : vector<16x64xf32> to vector<16x32xf32>
    %cst_38 = arith.constant 9.99999996E-13 : f32
    %78 = vector.broadcast %cst_38 : f32 to vector<16x32xf32>
    %79 = arith.maximumf %77, %78 : vector<16x32xf32>
    %80 = tpu.reciprocal %79 {approx = true} : vector<16x32xf32> -> vector<16x32xf32>
    %81 = arith.mulf %76, %80 : vector<16x32xf32>
    %82 = arith.addf %27, %81 : vector<16x32xf32>
    %83 = arith.truncf %82 : vector<16x32xf32> to vector<16x32xbf16>
    %c0_39 = arith.constant 0 : index
    %c0_40 = arith.constant 0 : index
    %84 = vector.load %arg14[%c0_39, %c0_40] : memref<32x64xbf16, #tpu.memory_space<vmem>>, vector<32x64xbf16>
    %cst_41 = arith.constant dense<0.000000e+00> : vector<16x64xf32>
    %85 = tpu.matmul %83, %84, %cst_41 {dimension_numbers = #tpu.dot_dimension_numbers<[1], [0], [0], [1], [0, 0, 1, 1], [], []>} : vector<16x32xbf16>, vector<32x64xbf16>, vector<16x64xf32> -> vector<16x64xf32>
    %c0_42 = arith.constant 0 : index
    %c0_43 = arith.constant 0 : index
    %86 = vector.load %arg15[%c0_42, %c0_43] : memref<1x64xf32, #tpu.memory_space<vmem>>, vector<1x64xf32>
    %c0_44 = arith.constant 0 : index
    %c0_45 = arith.constant 0 : index
    %87 = vector.load %arg16[%c0_44, %c0_45] : memref<1x64xf32, #tpu.memory_space<vmem>>, vector<1x64xf32>
    %cst_46 = arith.constant dense<0.000000e+00> : vector<64xf32>
    %88 = vector.multi_reduction <add>, %85, %cst_46 [0] : vector<16x64xf32> to vector<64xf32>
    %89 = vector.shape_cast %88 : vector<64xf32> to vector<1x64xf32>
    %cst_47 = arith.constant 1.600000e+01 : f32
    %90 = vector.broadcast %cst_47 : f32 to vector<1x64xf32>
    %91 = arith.divf %89, %90 : vector<1x64xf32>
    %92 = arith.mulf %85, %85 : vector<16x64xf32>
    %cst_48 = arith.constant dense<0.000000e+00> : vector<64xf32>
    %93 = vector.multi_reduction <add>, %92, %cst_48 [0] : vector<16x64xf32> to vector<64xf32>
    %94 = vector.shape_cast %93 : vector<64xf32> to vector<1x64xf32>
    %cst_49 = arith.constant 1.600000e+01 : f32
    %95 = vector.broadcast %cst_49 : f32 to vector<1x64xf32>
    %96 = arith.divf %94, %95 : vector<1x64xf32>
    %97 = arith.mulf %91, %91 : vector<1x64xf32>
    %98 = arith.subf %96, %97 : vector<1x64xf32>
    %cst_50 = arith.constant 0.000000e+00 : f32
    %99 = vector.broadcast %cst_50 : f32 to vector<1x64xf32>
    %100 = arith.maximumf %98, %99 : vector<1x64xf32>
    %101 = vector.broadcast %91 : vector<1x64xf32> to vector<16x64xf32>
    %102 = arith.subf %85, %101 : vector<16x64xf32>
    %cst_51 = arith.constant 9.99999974E-6 : f32
    %103 = vector.broadcast %cst_51 : f32 to vector<1x64xf32>
    %104 = arith.addf %100, %103 : vector<1x64xf32>
    %105 = math.rsqrt %104 : vector<1x64xf32>
    %106 = arith.mulf %105, %86 : vector<1x64xf32>
    %107 = vector.broadcast %106 : vector<1x64xf32> to vector<16x64xf32>
    %108 = arith.mulf %102, %107 : vector<16x64xf32>
    %109 = vector.broadcast %87 : vector<1x64xf32> to vector<16x64xf32>
    %110 = arith.addf %108, %109 : vector<16x64xf32>
    %cst_52 = arith.constant 0.000000e+00 : f32
    %111 = vector.broadcast %cst_52 : f32 to vector<16x64xf32>
    %112 = arith.maximumf %110, %111 : vector<16x64xf32>
    %113 = arith.truncf %112 : vector<16x64xf32> to vector<16x64xbf16>
    %c0_53 = arith.constant 0 : index
    %c0_54 = arith.constant 0 : index
    %114 = vector.load %arg17[%c0_53, %c0_54] : memref<64x32xbf16, #tpu.memory_space<vmem>>, vector<64x32xbf16>
    %cst_55 = arith.constant dense<0.000000e+00> : vector<16x32xf32>
    %115 = tpu.matmul %113, %114, %cst_55 {dimension_numbers = #tpu.dot_dimension_numbers<[1], [0], [0], [1], [0, 0, 1, 1], [], []>} : vector<16x64xbf16>, vector<64x32xbf16>, vector<16x32xf32> -> vector<16x32xf32>
    %c0_56 = arith.constant 0 : index
    %c0_57 = arith.constant 0 : index
    %116 = vector.load %arg18[%c0_56, %c0_57] : memref<1x32xf32, #tpu.memory_space<vmem>>, vector<1x32xf32>
    %117 = vector.broadcast %116 : vector<1x32xf32> to vector<16x32xf32>
    %118 = arith.addf %115, %117 : vector<16x32xf32>
    %119 = arith.addf %118, %27 : vector<16x32xf32>
    %c1 = arith.constant 1 : index
    %120 = memref.load %arg0[%c1] : memref<2xf32, #tpu.memory_space<smem>>
    %121 = arith.truncf %119 : vector<16x32xf32> to vector<16x32xbf16>
    %cst_58 = arith.constant dense<0.000000e+00> : vector<48x32xf32>
    %122 = tpu.matmul %56, %121, %cst_58 {dimension_numbers = #tpu.dot_dimension_numbers<[1], [0], [0], [1], [0, 0, 1, 1], [], []>} : vector<48x16xbf16>, vector<16x32xbf16>, vector<48x32xf32> -> vector<48x32xf32>
    %123 = arith.addf %122, %55 : vector<48x32xf32>
    %cst_59 = arith.constant 0.000000e+00 : f32
    %124 = vector.broadcast %cst_59 : f32 to vector<48x32xf32>
    %125 = arith.maximumf %123, %124 : vector<48x32xf32>
    %cst_60 = arith.constant 1.000000e-07 : f32
    %126 = vector.broadcast %cst_60 : f32 to vector<48x32xf32>
    %127 = arith.addf %125, %126 : vector<48x32xf32>
    %128 = vector.broadcast %120 : f32 to vector<48x32xf32>
    %129 = arith.mulf %128, %127 : vector<48x32xf32>
    %cst_61 = arith.constant dense<0xFF800000> : vector<32xf32>
    %130 = vector.multi_reduction <maximumf>, %129, %cst_61 [0] : vector<48x32xf32> to vector<32xf32>
    %131 = vector.shape_cast %130 : vector<32xf32> to vector<1x32xf32>
    %132 = vector.broadcast %131 : vector<1x32xf32> to vector<48x32xf32>
    %133 = arith.subf %129, %132 : vector<48x32xf32>
    %134 = math.exp %133 : vector<48x32xf32>
    %135 = arith.mulf %134, %127 : vector<48x32xf32>
    %136 = tpu.concatenate %135, %134 in 1 : vector<48x32xf32>, vector<48x32xf32> -> vector<48x64xf32>
    %cst_62 = arith.constant dense<0.000000e+00> : vector<16x64xf32>
    %137 = tpu.matmul %57, %136, %cst_62 {dimension_numbers = #tpu.dot_dimension_numbers<[1], [0], [0], [1], [0, 0, 1, 1], [], []>} : vector<16x48xf32>, vector<48x64xf32>, vector<16x64xf32> -> vector<16x64xf32>
    %138 = vector.extract_strided_slice %137 {offsets = [0, 0], sizes = [16, 32], strides = [1, 1]} : vector<16x64xf32> to vector<16x32xf32>
    %139 = vector.extract_strided_slice %137 {offsets = [0, 32], sizes = [16, 32], strides = [1, 1]} : vector<16x64xf32> to vector<16x32xf32>
    %cst_63 = arith.constant 9.99999996E-13 : f32
    %140 = vector.broadcast %cst_63 : f32 to vector<16x32xf32>
    %141 = arith.maximumf %139, %140 : vector<16x32xf32>
    %142 = tpu.reciprocal %141 {approx = true} : vector<16x32xf32> -> vector<16x32xf32>
    %143 = arith.mulf %138, %142 : vector<16x32xf32>
    %144 = arith.addf %119, %143 : vector<16x32xf32>
    %145 = arith.truncf %144 : vector<16x32xf32> to vector<16x32xbf16>
    %c0_64 = arith.constant 0 : index
    %c0_65 = arith.constant 0 : index
    %146 = vector.load %arg19[%c0_64, %c0_65] : memref<32x64xbf16, #tpu.memory_space<vmem>>, vector<32x64xbf16>
    %cst_66 = arith.constant dense<0.000000e+00> : vector<16x64xf32>
    %147 = tpu.matmul %145, %146, %cst_66 {dimension_numbers = #tpu.dot_dimension_numbers<[1], [0], [0], [1], [0, 0, 1, 1], [], []>} : vector<16x32xbf16>, vector<32x64xbf16>, vector<16x64xf32> -> vector<16x64xf32>
    %c0_67 = arith.constant 0 : index
    %c0_68 = arith.constant 0 : index
    %148 = vector.load %arg20[%c0_67, %c0_68] : memref<1x64xf32, #tpu.memory_space<vmem>>, vector<1x64xf32>
    %c0_69 = arith.constant 0 : index
    %c0_70 = arith.constant 0 : index
    %149 = vector.load %arg21[%c0_69, %c0_70] : memref<1x64xf32, #tpu.memory_space<vmem>>, vector<1x64xf32>
    %cst_71 = arith.constant dense<0.000000e+00> : vector<64xf32>
    %150 = vector.multi_reduction <add>, %147, %cst_71 [0] : vector<16x64xf32> to vector<64xf32>
    %151 = vector.shape_cast %150 : vector<64xf32> to vector<1x64xf32>
    %cst_72 = arith.constant 1.600000e+01 : f32
    %152 = vector.broadcast %cst_72 : f32 to vector<1x64xf32>
    %153 = arith.divf %151, %152 : vector<1x64xf32>
    %154 = arith.mulf %147, %147 : vector<16x64xf32>
    %cst_73 = arith.constant dense<0.000000e+00> : vector<64xf32>
    %155 = vector.multi_reduction <add>, %154, %cst_73 [0] : vector<16x64xf32> to vector<64xf32>
    %156 = vector.shape_cast %155 : vector<64xf32> to vector<1x64xf32>
    %cst_74 = arith.constant 1.600000e+01 : f32
    %157 = vector.broadcast %cst_74 : f32 to vector<1x64xf32>
    %158 = arith.divf %156, %157 : vector<1x64xf32>
    %159 = arith.mulf %153, %153 : vector<1x64xf32>
    %160 = arith.subf %158, %159 : vector<1x64xf32>
    %cst_75 = arith.constant 0.000000e+00 : f32
    %161 = vector.broadcast %cst_75 : f32 to vector<1x64xf32>
    %162 = arith.maximumf %160, %161 : vector<1x64xf32>
    %163 = vector.broadcast %153 : vector<1x64xf32> to vector<16x64xf32>
    %164 = arith.subf %147, %163 : vector<16x64xf32>
    %cst_76 = arith.constant 9.99999974E-6 : f32
    %165 = vector.broadcast %cst_76 : f32 to vector<1x64xf32>
    %166 = arith.addf %162, %165 : vector<1x64xf32>
    %167 = math.rsqrt %166 : vector<1x64xf32>
    %168 = arith.mulf %167, %148 : vector<1x64xf32>
    %169 = vector.broadcast %168 : vector<1x64xf32> to vector<16x64xf32>
    %170 = arith.mulf %164, %169 : vector<16x64xf32>
    %171 = vector.broadcast %149 : vector<1x64xf32> to vector<16x64xf32>
    %172 = arith.addf %170, %171 : vector<16x64xf32>
    %cst_77 = arith.constant 0.000000e+00 : f32
    %173 = vector.broadcast %cst_77 : f32 to vector<16x64xf32>
    %174 = arith.maximumf %172, %173 : vector<16x64xf32>
    %175 = arith.truncf %174 : vector<16x64xf32> to vector<16x64xbf16>
    %c0_78 = arith.constant 0 : index
    %c0_79 = arith.constant 0 : index
    %176 = vector.load %arg22[%c0_78, %c0_79] : memref<64x32xbf16, #tpu.memory_space<vmem>>, vector<64x32xbf16>
    %cst_80 = arith.constant dense<0.000000e+00> : vector<16x32xf32>
    %177 = tpu.matmul %175, %176, %cst_80 {dimension_numbers = #tpu.dot_dimension_numbers<[1], [0], [0], [1], [0, 0, 1, 1], [], []>} : vector<16x64xbf16>, vector<64x32xbf16>, vector<16x32xf32> -> vector<16x32xf32>
    %c0_81 = arith.constant 0 : index
    %c0_82 = arith.constant 0 : index
    %178 = vector.load %arg23[%c0_81, %c0_82] : memref<1x32xf32, #tpu.memory_space<vmem>>, vector<1x32xf32>
    %179 = vector.broadcast %178 : vector<1x32xf32> to vector<16x32xf32>
    %180 = arith.addf %177, %179 : vector<16x32xf32>
    %181 = arith.addf %180, %119 : vector<16x32xf32>
    %c0_83 = arith.constant 0 : index
    %c0_84 = arith.constant 0 : index
    %182 = vector.load %arg12[%c0_83, %c0_84] : memref<1x32xf32, #tpu.memory_space<vmem>>, vector<1x32xf32>
    %183 = vector.broadcast %182 : vector<1x32xf32> to vector<16x32xf32>
    %184 = arith.mulf %181, %183 : vector<16x32xf32>
    %cst_85 = arith.constant dense<0.000000e+00> : vector<16xf32>
    %185 = vector.multi_reduction <add>, %184, %cst_85 [1] : vector<16x32xf32> to vector<16xf32>
    %186 = vector.shape_cast %185 : vector<16xf32> to vector<16x1xf32>
    %c0_86 = arith.constant 0 : index
    %c0_87 = arith.constant 0 : index
    %187 = vector.load %arg5[%c0_86, %c0_87] : memref<16x2xf32, #tpu.memory_space<vmem>>, vector<16x2xf32>
    %188 = vector.broadcast %186 : vector<16x1xf32> to vector<16x2xf32>
    %189 = arith.mulf %187, %188 : vector<16x2xf32>
    %cst_88 = arith.constant dense<0.000000e+00> : vector<2xf32>
    %190 = vector.multi_reduction <add>, %189, %cst_88 [0] : vector<16x2xf32> to vector<2xf32>
    %191 = vector.shape_cast %190 : vector<2xf32> to vector<1x2xf32>
    %c0_89 = arith.constant 0 : index
    %c0_90 = arith.constant 0 : index
    %192 = vector.load %arg13[%c0_89, %c0_90] : memref<1x1xf32, #tpu.memory_space<vmem>>, vector<1x1xf32>
    %193 = vector.broadcast %192 : vector<1x1xf32> to vector<1x2xf32>
    %194 = arith.addf %191, %193 : vector<1x2xf32>
    %195 = arith.negf %194 : vector<1x2xf32>
    %196 = math.exp %195 : vector<1x2xf32>
    %cst_91 = arith.constant 1.000000e+00 : f32
    %197 = vector.broadcast %cst_91 : f32 to vector<1x2xf32>
    %198 = arith.addf %197, %196 : vector<1x2xf32>
    %199 = arith.divf %197, %198 : vector<1x2xf32>
    %c0_92 = arith.constant 0 : index
    %c0_93 = arith.constant 0 : index
    %200 = vector.load %arg24[%c0_92, %c0_93] : memref<1x2xf32, #tpu.memory_space<vmem>>, vector<1x2xf32>
    tpu.vector_store %arg24[%c0_92, %c0_93], %199 {strides = array<i32>} : memref<1x2xf32, #tpu.memory_space<vmem>>, vector<1x2xf32>,
    return
  }
}

</mosaic_0001>

<bundles_post_ra>
// kernel: bv_model_forward.1
= control target key start
LH: loop header
LB: loop body
LE: loop exit
PB: predicated region body
PF: predicated region fallthrough
CT: control target
= control target key end

     0   :  { %s1729_s0 = inlined_call_operand.vmem [shape: f32[2], index: 0, kind: input, shape index: {}]   ;;  %s1730_s1 = inlined_call_operand.vmem [shape: bf16[16,6], index: 1, kind: input, shape index: {}]   ;;  %s1731_s2 = inlined_call_operand.vmem [shape: bf16[48,4], index: 2, kind: input, shape index: {}]   ;;  %s1732_s3 = inlined_call_operand.vmem [shape: bf16[48,16], index: 3, kind: input, shape index: {}]   ;;  %s1733_s4 = inlined_call_operand.vmem [shape: f32[16,48], index: 4, kind: input, shape index: {}]   ;;  %s1734_s5 = inlined_call_operand.vmem [shape: f32[16,2], index: 5, kind: input, shape index: {}]   ;;  %s1735_s6 = inlined_call_operand.vmem [shape: bf16[6,32], index: 6, kind: input, shape index: {}]   ;;  %s1736_s7 = inlined_call_operand.vmem [shape: bf16[4,32], index: 7, kind: input, shape index: {}]   ;;  %s1737_s8 = inlined_call_operand.vmem [shape: f32[1,32], index: 8, kind: input, shape index: {}]   ;;  %s1738_s9 = inlined_call_operand.vmem [shape: f32[1,32], index: 9, kind: input, shape index: {}]   ;;  %s1739_s10 = inlined_call_operand.vmem [shape: f32[1,32], index: 10, kind: input, shape index: {}]   ;;  %s1740_s11 = inlined_call_operand.vmem [shape: f32[1,32], index: 11, kind: input, shape index: {}]   ;;  %s1741_s12 = inlined_call_operand.vmem [shape: f32[1,32], index: 12, kind: input, shape index: {}]   ;;  %s1742_s13 = inlined_call_operand.<no memory space> [shape: f32[1,1], index: 13, kind: input, shape index: {}]   ;;  %s1743_s14 = inlined_call_operand.vmem [shape: bf16[32,64], index: 14, kind: input, shape index: {}]   ;;  %s1744_s15 = inlined_call_operand.vmem [shape: f32[1,64], index: 15, kind: input, shape index: {}]   ;;  %s1745_s16 = inlined_call_operand.vmem [shape: f32[1,64], index: 16, kind: input, shape index: {}]   ;;  %s1746_s17 = inlined_call_operand.vmem [shape: bf16[64,32], index: 17, kind: input, shape index: {}]   ;;  %s1747_s18 = inlined_call_operand.vmem [shape: f32[1,32], index: 18, kind: input, shape index: {}]   ;;  %s1748_s19 = inlined_call_operand.vmem [shape: bf16[32,64], index: 19, kind: input, shape index: {}]   ;;  %s1749_s20 = inlined_call_operand.vmem [shape: f32[1,64], index: 20, kind: input, shape index: {}]   ;;  %s1750_s21 = inlined_call_operand.vmem [shape: f32[1,64], index: 21, kind: input, shape index: {}]   ;;  %s1751_s22 = inlined_call_operand.vmem [shape: bf16[64,32], index: 22, kind: input, shape index: {}]   ;;  %s1752_s23 = inlined_call_operand.vmem [shape: f32[1,32], index: 23, kind: input, shape index: {}]   ;;  %s1753_s24 = inlined_call_operand.hbm [shape: f32[1,2], index: 24, kind: output, shape index: {}]  }
   0x1   :  { %1758 = sst [smem:[#allocation9_spill]] %s1729_s0  ;;  %v29_v0 = vstv %s1742_s13 }
   0x2   :  { %1759 = sst [smem:[#allocation10_spill]] %s1730_s1  ;;  %30 = vst [vmem:[#allocation2] sm:$0x1] %v29_v0 }
   0x3   :  { %1760 = sst [smem:[#allocation11_spill]] %s1731_s2 }
   0x4   :  { %1761 = sst [smem:[#allocation12_spill]] %s1732_s3 }
   0x5   :  { %1762 = sst [smem:[#allocation13_spill]] %s1733_s4 }
   0x6   :  { %1763 = sst [smem:[#allocation14_spill]] %s1734_s5 }
   0x7   :  { %1764 = sst [smem:[#allocation15_spill]] %s1735_s6 }
   0x8   :  { %1765 = sst [smem:[#allocation16_spill]] %s1736_s7 }
   0x9   :  { %1766 = sst [smem:[#allocation17_spill]] %s1737_s8 }
   0xa   :  { %31 = vsyncpa [#allocation5], 0 }
   0xb   :  { %32 = vsyncpa [#allocation4], 0  ;;  %s1767_s6 = sld [smem:[#allocation9_spill]]  ;;  %s1282_s29 = smov [#allocation3]  }
  0x11   :  { %s38_s2 = sshll.u32 %s1767_s6, 4  ;;  %s39_s2 = int_to_ptr.vmem [resolvable:$true] %s38_s2 }
  0x12   :  { %41 = dma.vmem_to_smem %s39_s2, 16, %s1282_s29, [#allocation5]  }
  0x13   :  { %1278 = dma.done.wait [#allocation5], 16  }
  0x14   :  { %1279 = vsyncadd [#allocation5], 4294967280 }
  0x15   :  { %92 = sfence }
  0x16   :  { %s1768_s30 = sld [smem:[#allocation15_spill]]  ;;  %vm106_vm0 = vcmask 1042432   ;;  %vm213_vm1 = vcmask 1041408   ;;  %vm102_vm2 = vcmask 48128   ;;  %vm203_vm3 = vcmask 31744   ;;  %s1286_s3 = smov 96  }
  0x17   :  { %s1769_s25 = sld [smem:[#allocation10_spill]]  ;;  %v1283_v9 = vmov 16.0   ;;  %vm126_vm4 = vcmask 261120   ;;  %v1187_v56 = vld [vmem:[%s1738_s9] ss:$0 sm:$0xff]  ;;  %vm354_vm9 = vcmask 130048  }
  0x18   :  { %s1770_s1 = sld [smem:[#allocation16_spill]]  ;;  %1194 = vrcp.f32 %v1283_v9  ;;  %vm478_vm14 = vcmask 392192   ;;  %vm560_vm15 = vcmask 523264  }
  0x19   :  { %s1771_s27 = sld [smem:[#allocation11_spill]] }
  0x1a   :  { %s1773_s4 = sld [smem:[#allocation12_spill]] }
  0x1b   :  { %s1774_s7 = sld [smem:[#allocation13_spill]] }
  0x1c   :  { %v96_v1 = vld [vmem:[%s1768_s30] sm:$0x7]  ;;  %s1772_s30 = sld [smem:[#allocation17_spill]] }
  0x1d   :  { %v108_v2 = vsel %vm106_vm0, %v96_v1, 0  ;;  %v1130_v3 = vld [vmem:[%s1769_s25] sm:$0xff] }
  0x1e   :  { %v187_v4 = vld [vmem:[%s1770_s1] sm:$0x3]  ;;  %117 = vmatpush.bf16.msra.mxu3 %v108_v2  ;;  %v1195_v11 = vpop.eup %1194 }
  0x1f   :  { %v1131_v5 = vld [vmem:[%s1771_s27] sm:$0xff]  ;;  %v215_v6 = vsel %vm213_vm1, %v187_v4, 0  ;;  %v1132_v7 = vld [vmem:[%s1771_s27 + $0x8] sm:$0xff]  ;;  %v1133_v8 = vld [vmem:[%s1771_s27 + $0x10] sm:$0xff]  ;;  %v137_v12 = vmul.f32 16.0, %v1195_v11  ;;  %vm141_vm5 = vweird.f32 %v1195_v11 }
  0x20   :  { %224 = vmatpush.bf16.msra.mxu1 %v215_v6  ;;  %v1461_v62 = vld [vmem:[%s1773_s4] sm:$0xff]  ;;  %v1468_v63 = vld [vmem:[%s1773_s4 + $0x8] sm:$0xff]  ;;  %v1479_v2 = vld [vmem:[%s1773_s4 + $0x10] sm:$0xff] }
  0x21   :  { %1038 = vmatmul.msk.bf16.vlgmr.msra.gmra.mxu3 %vm102_vm2, %v1130_v3  ;;  %v138_v17 = vsub.f32 1.0, %v137_v12 }
  0x22   :  { %v124_v49 = vld [vmem:[%s1772_s30] sm:$0x1] }
  0x23   :  { %1051 = vmatmul.msk.bf16.vlgmr.msra.gmra.mxu1 %vm203_vm3, %v1131_v5  ;;  %v139_v24 = vmul.f32 %v1195_v11, %v138_v17 }
  0x25   :  { %v140_v29 = vadd.f32 %v1195_v11, %v139_v24 }
  0x27   :  { %v1442_v34 = vsel %vm141_vm5, %v1195_v11, %v140_v29 }
  0x33   :  { %1052 = vmatmul.msk.bf16.gmra.mxu1 %vm203_vm3, %v1132_v7 }
  0x43   :  { %1053 = vmatmul.msk.bf16.gmra.mxu1 %vm203_vm3, %v1133_v8 }
  0xa0   :  { %v1470_v0 = vpop.f32.mrf.mxu1 }
  0xa1   :  { %v243_v5 = vsel %vm126_vm4, %v1470_v0, 0.0  ;;  %v268_v6 = vmul.f32 %v1470_v0, %v1470_v0 }
  0xa3   :  { %v274_v11 = vsel %vm126_vm4, %v268_v6, 0.0 }
  0xa4   :  { %v119_v10 = vpop.f32.mrf.mxu3 }
  0xa5   :  { %v144_v13 = vmul.f32 %v119_v10, %v119_v10  ;;  %v127_v15 = vsel %vm126_vm4, %v119_v10, 0.0 }
  0xa7   :  { %v146_v20 = vsel %vm126_vm4, %v144_v13, 0.0 }
  0xa8   :  { %v1474_v1 = vpop.f32.mrf.mxu1 }
  0xa9   :  { %v244_v7 = vsel %vm126_vm4, %v1474_v1, 0.0  ;;  %v269_v8 = vmul.f32 %v1474_v1, %v1474_v1 }
  0xaa   :  { %v245_v9 = vadd.f32 %v244_v7, %v243_v5 }
  0xab   :  { %v275_v12 = vsel %vm126_vm4, %v269_v8, 0.0 }
  0xac   :  { %v121_v14 = vpop.f32.mrf.mxu3 }
  0xad   :  { %v128_v16 = vsel %vm126_vm4, %v121_v14, 0.0  ;;  %v145_v18 = vmul.f32 %v121_v14, %v121_v14 }
  0xae   :  { %v129_v19 = vadd.f32 %v128_v16, %v127_v15  ;;  %v276_v15 = vadd.f32 %v275_v12, %v274_v11 }
  0xaf   :  { %v147_v21 = vsel %vm126_vm4, %v145_v18, 0.0 }
  0xb0   :  { %v130_v22 = vrot.slane %v129_v19, 4  ;;  %v148_v23 = vadd.f32 %v147_v21, %v146_v20  ;;  %v1483_v3 = vpop.f32.mrf.mxu1 }
  0xb1   :  { %v246_v13 = vsel %vm126_vm4, %v1483_v3, 0.0 }
  0xb2   :  { %v131_v25 = vadd.f32 %v130_v22, %v129_v19  ;;  %v149_v26 = vrot.slane %v148_v23, 4  ;;  %v247_v16 = vadd.f32 %v246_v13, %v245_v9 }
  0xb4   :  { %v132_v27 = vrot.slane %v131_v25, 2  ;;  %v150_v28 = vadd.f32 %v149_v26, %v148_v23 }
  0xb6   :  { %v133_v30 = vadd.f32 %v132_v27, %v131_v25  ;;  %v151_v31 = vrot.slane %v150_v28, 2 }
  0xb8   :  { %v134_v32 = vrot.slane %v133_v30, 1  ;;  %v152_v33 = vadd.f32 %v151_v31, %v150_v28  ;;  %v1485_v4 = vpop.f32.mrf.mxu1 }
  0xb9   :  { %v248_v18 = vsel %vm126_vm4, %v1485_v4, 0.0  ;;  %v271_v19 = vmul.f32 %v1485_v4, %v1485_v4 }
  0xba   :  { %v135_v35 = vadd.f32 %v134_v32, %v133_v30  ;;  %v153_v36 = vrot.slane %v152_v33, 1  ;;  %v249_v21 = vadd.f32 %v248_v18, %v247_v16 }
  0xbb   :  { %v279_v22 = vsel %vm126_vm4, %v271_v19, 0.0 }
  0xbc   :  { %v143_v37 = vmul.f32 %v1442_v34, %v135_v35  ;;  %v154_v38 = vadd.f32 %v153_v36, %v152_v33  ;;  %v1284_v33 = vmov 48.0  }
  0xbe   :  { %v155_v39 = vmul.f32 %v154_v38, %v1442_v34  ;;  %v156_v40 = vmul.f32 %v143_v37, %v143_v37  ;;  %v160_v53 = vsub.f32 %v121_v14, %v143_v37  ;;  %v159_v55 = vsub.f32 %v119_v10, %v143_v37 }
  0xbf   :  { %v270_v14 = vmul.f32 %v1483_v3, %v1483_v3 }
  0xc0   :  { %v157_v41 = vsub.f32 %v155_v39, %v156_v40  ;;  %v1495_v10 = vpop.f32.mrf.mxu1 }
  0xc1   :  { %v277_v17 = vsel %vm126_vm4, %v270_v14, 0.0  ;;  %v250_v23 = vsel %vm126_vm4, %v1495_v10, 0.0  ;;  %v272_v24 = vmul.f32 %v1495_v10, %v1495_v10 }
  0xc2   :  { %v158_v42 = vmax.f32 %v157_v41, 0.0  ;;  %v278_v20 = vadd.f32 %v277_v17, %v276_v15  ;;  %v251_v27 = vadd.f32 %v250_v23, %v249_v21  ;;  %v241_v15 = vld [vmem:[%s1739_s10] sm:$0x1]  ;;  %s337_s10 = sld [smem:[#allocation3]] }
  0xc3   :  { %v281_v28 = vsel %vm126_vm4, %v272_v24, 0.0 }
  0xc4   :  { %v161_v43 = vadd.f32 1e-05, %v158_v42  ;;  %v280_v26 = vadd.f32 %v279_v22, %v278_v20 }
  0xc6   :  { %1196 = vrsqrt.f32 %v161_v43  ;;  %vm168_vm7 = vweird.f32 %v161_v43  ;;  %v282_v31 = vadd.f32 %v281_v28, %v280_v26  ;;  %v1188_v28 = vld [vmem:[%s1740_s11] ss:$0 sm:$0xff]  ;;  %s1285_s11 = smov 32  }
  0xc7   :  { %1198 = vrcp.f32 %v1284_v33 }
  0xc8   :  { %v1513_v25 = vpop.f32.mrf.mxu1 }
  0xc9   :  { %v252_v29 = vsel %vm126_vm4, %v1513_v25, 0.0  ;;  %v273_v30 = vmul.f32 %v1513_v25, %v1513_v25 }
  0xca   :  { %v253_v32 = vadd.f32 %v252_v29, %v251_v27 }
  0xcb   :  { %v283_v35 = vsel %vm126_vm4, %v273_v30, 0.0 }
  0xcc   :  { %v1197_v44 = vpop.eup %1196  ;;  %v254_v36 = vrot.slane %v253_v32, 4  ;;  %v284_v37 = vadd.f32 %v283_v35, %v282_v31 }
  0xcd   :  { %v163_v45 = vmul.f32 %v1197_v44, %v161_v43  ;;  %vm169_vm6 = vweird.f32 %v1197_v44  ;;  %v1199_v38 = vpop.eup %1198 }
  0xce   :  { %vm170_vm8 = vmor %vm168_vm7, %vm169_vm6  ;;  %v255_v39 = vadd.f32 %v254_v36, %v253_v32  ;;  %v285_v40 = vrot.slane %v284_v37, 4  ;;  %v261_v41 = vmul.f32 48.0, %v1199_v38  ;;  %vm265_vm10 = vweird.f32 %v1199_v38 }
  0xcf   :  { %v164_v46 = vmul.f32 %v1197_v44, %v163_v45  ;;  %vm978_vm7 = vcmask 15360  }
  0xd0   :  { %v256_v42 = vrot.slane %v255_v39, 2  ;;  %v286_v43 = vadd.f32 %v285_v40, %v284_v37 }
  0xd1   :  { %v165_v47 = vmul.f32 0.5, %v164_v46 }
  0xd2   :  { %v257_v45 = vadd.f32 %v256_v42, %v255_v39  ;;  %v287_v46 = vrot.slane %v286_v43, 2 }
  0xd3   :  { %v166_v48 = vsub.f32 1.5, %v165_v47 }
  0xd5   :  { %v167_v50 = vmul.f32 %v1197_v44, %v166_v48  ;;  %v258_v48 = vrot.slane %v257_v45, 1 }
  0xd7   :  { %v171_v51 = vsel %vm170_vm8, %v1197_v44, %v167_v50  ;;  %v262_v44 = vsub.f32 1.0, %v261_v41 }
  0xd8   :  { %v172_v52 = vmul.f32 %v171_v51, %v124_v49  ;;  %v288_v49 = vadd.f32 %v287_v46, %v286_v43  ;;  %v259_v51 = vadd.f32 %v258_v48, %v257_v45 }
  0xd9   :  { %v263_v47 = vmul.f32 %v1199_v38, %v262_v44 }
  0xda   :  { %v173_v54 = vperm.slane %v172_v52, 0  ;;  %v289_v52 = vrot.slane %v288_v49, 1 }
  0xdb   :  { %v264_v50 = vadd.f32 %v1199_v38, %v263_v47 }
  0xdc   :  { %v175_v57 = vmul.f32 %v173_v54, %v160_v53  ;;  %v174_v58 = vmul.f32 %v173_v54, %v159_v55  ;;  %v290_v55 = vadd.f32 %v289_v52, %v288_v49 }
  0xdd   :  { %v266_v53 = vsel %vm265_vm10, %v1199_v38, %v264_v50  ;;  %vm1015_vm10 = vcmask 8192  }
  0xde   :  { %v1452_v59 = vadd.f32 %v1187_v56, %v174_v58  ;;  %v1454_v60 = vadd.f32 %v1187_v56, %v175_v57  ;;  %v267_v54 = vmul.f32 %v266_v53, %v259_v51  ;;  %v291_v56 = vmul.f32 %v290_v55, %v266_v53 }
  0xdf   :  { %v400_v53 = vstv %s337_s10  ;;  %s1775_s10 = sld [smem:[#allocation14_spill]] }
  0xe0   :  { %v338_v61 = vpack.c.bf16 %v1454_v60, %v1452_v59  ;;  %v292_v57 = vmul.f32 %v267_v54, %v267_v54  ;;  %v295_v19 = vsub.f32 %v1470_v0, %v267_v54  ;;  %v296_v21 = vsub.f32 %v1474_v1, %v267_v54 }
  0xe1   :  { %v298_v22 = vsub.f32 %v1485_v4, %v267_v54  ;;  %v299_v23 = vsub.f32 %v1495_v10, %v267_v54  ;;  %v297_v24 = vsub.f32 %v1483_v3, %v267_v54  ;;  %v300_v0 = vsub.f32 %v1513_v25, %v267_v54 }
  0xe2   :  { %371 = vmatpush.bf16.msra.mxu2 %v338_v61  ;;  %v293_v58 = vsub.f32 %v291_v56, %v292_v57 }
  0xe4   :  { %v294_v61 = vmax.f32 %v293_v58, 0.0 }
  0xe5   :  { %1066 = vmatmul.msk.bf16.vlgmr.msra.gmra.mxu2 %vm354_vm9, %v1461_v62 }
  0xe6   :  { %v301_v5 = vadd.f32 1e-05, %v294_v61 }
  0xe8   :  { %1200 = vrsqrt.f32 %v301_v5  ;;  %vm308_vm11 = vweird.f32 %v301_v5 }
  0xee   :  { %v1201_v6 = vpop.eup %1200 }
  0xef   :  { %v303_v7 = vmul.f32 %v1201_v6, %v301_v5  ;;  %vm309_vm12 = vweird.f32 %v1201_v6 }
  0xf0   :  { %vm310_vm13 = vmor %vm308_vm11, %vm309_vm12 }
  0xf1   :  { %v304_v8 = vmul.f32 %v1201_v6, %v303_v7 }
  0xf3   :  { %v305_v11 = vmul.f32 0.5, %v304_v8 }
  0xf5   :  { %1067 = vmatmul.msk.bf16.gmra.mxu2 %vm354_vm9, %v1468_v63  ;;  %v306_v12 = vsub.f32 1.5, %v305_v11 }
  0xf7   :  { %v307_v14 = vmul.f32 %v1201_v6, %v306_v12 }
  0xf9   :  { %v311_v16 = vsel %vm310_vm13, %v1201_v6, %v307_v14 }
  0xfa   :  { %v312_v18 = vmul.f32 %v311_v16, %v241_v15 }
  0xfc   :  { %v313_v20 = vperm.slane %v312_v18, 0 }
  0xfe   :  { %v314_v27 = vmul.f32 %v313_v20, %v295_v19  ;;  %v315_v29 = vmul.f32 %v313_v20, %v296_v21  ;;  %v317_v30 = vmul.f32 %v313_v20, %v298_v22  ;;  %v318_v31 = vmul.f32 %v313_v20, %v299_v23 }
  0xff   :  { %v316_v32 = vmul.f32 %v313_v20, %v297_v24  ;;  %v319_v41 = vmul.f32 %v313_v20, %v300_v0 }
 0x100   :  { %v1533_v33 = vadd.f32 %v1188_v28, %v314_v27  ;;  %v1535_v1 = vadd.f32 %v1188_v28, %v315_v29  ;;  %v1537_v4 = vadd.f32 %v1188_v28, %v317_v30  ;;  %v1539_v10 = vadd.f32 %v1188_v28, %v318_v31 }
 0x101   :  { %v1541_v3 = vadd.f32 %v1188_v28, %v316_v32  ;;  %v1548_v47 = vadd.f32 %v1188_v28, %v319_v41 }
 0x105   :  { %1068 = vmatmul.msk.bf16.gmra.mxu2 %vm354_vm9, %v1479_v2 }
 0x168   :  { %v373_v9 = vpop.f32.mrf.mxu2 }
 0x169   :  { %v374_v36 = vadd.f32 %v373_v9, %v1533_v33 }
 0x16b   :  { %v388_v42 = vmax.f32 %v374_v36, 0.0 }
 0x16d   :  { %v1550_v49 = vadd.f32 1e-07, %v388_v42 }
 0x16f   :  { %v401_v57 = vmul.f32 %v400_v53, %v1550_v49 }
 0x170   :  { %v375_v13 = vpop.f32.mrf.mxu2 }
 0x171   :  { %v376_v37 = vadd.f32 %v375_v13, %v1535_v1  ;;  %v407_v9 = vsel %vm126_vm4, %v401_v57, -inf }
 0x173   :  { %v389_v43 = vmax.f32 %v376_v37, 0.0 }
 0x175   :  { %v1552_v50 = vadd.f32 1e-07, %v389_v43 }
 0x177   :  { %v402_v58 = vmul.f32 %v400_v53, %v1552_v50 }
 0x178   :  { %v378_v17 = vpop.f32.mrf.mxu2 }
 0x179   :  { %v379_v25 = vadd.f32 %v378_v17, %v1541_v3  ;;  %v408_v11 = vsel %vm126_vm4, %v402_v58, -inf }
 0x17b   :  { %v390_v45 = vmax.f32 %v379_v25, 0.0 }
 0x17d   :  { %v396_v54 = vadd.f32 1e-07, %v390_v45 }
 0x17f   :  { %v403_v6 = vmul.f32 %v400_v53, %v396_v54 }
 0x180   :  { %v380_v26 = vpop.f32.mrf.mxu2 }
 0x181   :  { %v381_v38 = vadd.f32 %v380_v26, %v1537_v4  ;;  %v409_v16 = vsel %vm126_vm4, %v403_v6, -inf }
 0x183   :  { %v391_v44 = vmax.f32 %v381_v38, 0.0 }
 0x185   :  { %v397_v51 = vadd.f32 1e-07, %v391_v44 }
 0x187   :  { %v404_v61 = vmul.f32 %v400_v53, %v397_v51 }
 0x188   :  { %v383_v35 = vpop.f32.mrf.mxu2 }
 0x189   :  { %v384_v39 = vadd.f32 %v383_v35, %v1539_v10  ;;  %v410_v12 = vsel %vm126_vm4, %v404_v61, -inf }
 0x18a   :  { %v416_v17 = vmax.f32 %v409_v16, %v410_v12 }
 0x18b   :  { %v392_v40 = vmax.f32 %v384_v39, 0.0 }
 0x18d   :  { %v398_v46 = vadd.f32 1e-07, %v392_v40 }
 0x18f   :  { %v405_v55 = vmul.f32 %v400_v53, %v398_v46 }
 0x190   :  { %v385_v48 = vpop.f32.mrf.mxu2 }
 0x191   :  { %v386_v52 = vadd.f32 %v385_v48, %v1548_v47  ;;  %v411_v7 = vsel %vm126_vm4, %v405_v55, -inf }
 0x192   :  { %v412_v14 = vmax.f32 %v407_v9, %v411_v7 }
 0x193   :  { %v393_v56 = vmax.f32 %v386_v52, 0.0 }
 0x195   :  { %v399_v5 = vadd.f32 1e-07, %v393_v56 }
 0x197   :  { %v406_v8 = vmul.f32 %v400_v53, %v399_v5 }
 0x199   :  { %v413_v13 = vsel %vm126_vm4, %v406_v8, -inf }
 0x19a   :  { %v414_v15 = vmax.f32 %v408_v11, %v413_v13 }
 0x19c   :  { %v415_v18 = vmax.f32 %v412_v14, %v414_v15 }
 0x19e   :  { %v417_v19 = vmax.f32 %v415_v18, %v416_v17  ;;  %v1576_v17 = vld [vmem:[%s1774_s7] sm:$0xff] }
 0x1a0   :  { %v418_v20 = vrot.slane %v417_v19, 4 }
 0x1a2   :  { %v419_v21 = vmax.f32 %v417_v19, %v418_v20 }
 0x1a4   :  { %v420_v22 = vrot.slane %v419_v21, 2 }
 0x1a6   :  { %v421_v23 = vmax.f32 %v419_v21, %v420_v22 }
 0x1a8   :  { %v422_v24 = vrot.slane %v421_v23, 1 }
 0x1aa   :  { %v423_v26 = vmax.f32 %v421_v23, %v422_v24  ;;  %v1138_v24 = vld [vmem:[%s1743_s14 + $0x8] sm:$0xff] }
 0x1ab   :  { %550 = vmatpush.bf16.msra.mxu0 %v1138_v24 }
 0x1ac   :  { %v429_v27 = vsub.f32 %v406_v8, %v423_v26  ;;  %v428_v28 = vsub.f32 %v405_v55, %v423_v26  ;;  %v424_v29 = vsub.f32 %v401_v57, %v423_v26  ;;  %v425_v30 = vsub.f32 %v402_v58, %v423_v26 }
 0x1ad   :  { %v426_v31 = vsub.f32 %v403_v6, %v423_v26  ;;  %v427_v32 = vsub.f32 %v404_v61, %v423_v26  ;;  %v1137_v26 = vld [vmem:[%s1743_s14] sm:$0xff] }
 0x1ae   :  { %v440_v0 = vmul.f32 1.442695, %v429_v27  ;;  %v438_v35 = vmul.f32 1.442695, %v428_v28  ;;  %v430_v36 = vmul.f32 1.442695, %v424_v29 }
 0x1af   :  { %v432_v37 = vmul.f32 1.442695, %v425_v30  ;;  %v434_v38 = vmul.f32 1.442695, %v426_v31  ;;  %v436_v39 = vmul.f32 1.442695, %v427_v32  ;;  %551 = vmatpush.bf16.msra.mxu0 %v1137_v26 }
 0x1b0   :  { %1202 = vpow2.f32 %v440_v0 }
 0x1b1   :  { %1204 = vpow2.f32 %v438_v35 }
 0x1b2   :  { %1206 = vpow2.f32 %v430_v36 }
 0x1b3   :  { %1208 = vpow2.f32 %v432_v37 }
 0x1b4   :  { %1210 = vpow2.f32 %v434_v38 }
 0x1b5   :  { %1212 = vpow2.f32 %v436_v39 }
 0x1b6   :  { %v1203_v25 = vpop.eup %1202 }
 0x1b7   :  { %v1205_v40 = vpop.eup %1204  ;;  %v447_v41 = vmul.f32 %v1203_v25, %v399_v5 }
 0x1b8   :  { %v1207_v42 = vpop.eup %1206  ;;  %v1156_v43 = vpack.i.bf16 %v1205_v40, %v1203_v25  ;;  %v446_v44 = vmul.f32 %v1205_v40, %v398_v46 }
 0x1b9   :  { %v1209_v45 = vpop.eup %1208  ;;  %v442_v16 = vmul.f32 %v1207_v42, %v1550_v49 }
 0x1ba   :  { %v1211_v48 = vpop.eup %1210  ;;  %1157 = vrot.lane.b32.xlu0 %v1156_v43, %s1285_s11  ;;  %v1166_v52 = vpack.i.bf16 %v1207_v42, %v1209_v45  ;;  %v443_v14 = vmul.f32 %v1209_v45, %v1552_v50  ;;  %v1584_v50 = vld [vmem:[%s1774_s7 + $0x8] sm:$0xff] }
 0x1bb   :  { %v1213_v53 = vpop.eup %1212  ;;  %v444_v55 = vmul.f32 %v1211_v48, %v396_v54 }
 0x1bc   :  { %1167 = vrot.lane.b32.xlu1 %v1166_v52, %s1285_s11  ;;  %v445_v56 = vmul.f32 %v1213_v53, %v397_v51  ;;  %v1161_v57 = vpack.i.bf16 %v1211_v48, %v1213_v53 }
 0x1c2   :  { %1162 = vrot.lane.b32.xlu0 %v1161_v57, %s1285_s11  ;;  %v1142_v57 = vld [vmem:[%s1746_s17 + $0x18] sm:$0xff] }
 0x22c   :  { %v1158_v58 = vpop.permute.xlu0 %1157 }
 0x22d   :  { %v1160_v61 = vunpack.i.h.bf16 %v1158_v58  ;;  %v1159_v5 = vunpack.i.l.bf16 %v1158_v58 }
 0x22e   :  { %v1168_v7 = vpop.permute.xlu1 %1167 }
 0x22f   :  { %v477_v6 = vsel %vm126_vm4, %v447_v41, %v1159_v5  ;;  %v476_v46 = vsel %vm126_vm4, %v446_v44, %v1160_v61  ;;  %v1169_v54 = vunpack.i.l.bf16 %v1168_v7  ;;  %v1170_v51 = vunpack.i.h.bf16 %v1168_v7 }
 0x230   :  { %495 = vmatpush.msrb.mxu3 %v477_v6 }
 0x231   :  { %v473_v15 = vsel %vm126_vm4, %v443_v14, %v1169_v54  ;;  %v472_v18 = vsel %vm126_vm4, %v442_v16, %v1170_v51  ;;  %v1140_v54 = vld [vmem:[%s1746_s17 + $0x8] sm:$0xff] }
 0x232   :  { %496 = vmatpush.msrb.mxu3 %v476_v46  ;;  %v1141_v46 = vld [vmem:[%s1746_s17 + $0x10] sm:$0xff] }
 0x234   :  { %v1163_v8 = vpop.permute.xlu0 %1162 }
 0x235   :  { %v1165_v9 = vunpack.i.h.bf16 %v1163_v8  ;;  %v1164_v11 = vunpack.i.l.bf16 %v1163_v8 }
 0x237   :  { %v475_v12 = vsel %vm126_vm4, %v445_v56, %v1164_v11  ;;  %v474_v13 = vsel %vm126_vm4, %v444_v55, %v1165_v9 }
 0x238   :  { %497 = vmatpush.msrb.mxu3 %v475_v12 }
 0x23a   :  { %498 = vmatpush.msrb.mxu3 %v474_v13  ;;  %v1139_v13 = vld [vmem:[%s1746_s17] sm:$0xff]  ;;  %s1288_s17 = smov [#allocation6]  }
 0x23b   :  { %s1022_s0 = sshll.u32 %s1288_s17, 4  ;;  %s1023_s0 = int_to_ptr.vmem [resolvable:$true] %s1022_s0 }
 0x23c   :  { %499 = vmatpush.msrb.mxu3 %v473_v15 }
 0x23e   :  { %500 = vmatpush.msrb.mxu3 %v472_v18 }
 0x23f   :  { %1069 = vmatmul.msk.f32.vlgmr.msrb.gmra.mxu3 %vm478_vm14, %v1576_v17 }
 0x240   :  { %654 = vmatpush.bf16.msra.mxu3 %v1142_v57 }
 0x244   :  { %655 = vmatpush.bf16.msra.mxu3 %v1141_v46 }
 0x247   :  { %1070 = vmatmul.msk.f32.gmra.mxu3 %vm478_vm14, %v1584_v50 }
 0x248   :  { %656 = vmatpush.bf16.msra.mxu3 %v1140_v54 }
 0x24c   :  { %657 = vmatpush.bf16.msra.mxu3 %v1139_v13 }
 0x2c2   :  { %v502_v49 = vpop.f32.mrf.mxu3 }
 0x2c3   :  { %v508_v19 = vmax.f32 %v502_v49, 1e-12 }
 0x2c5   :  { %1214 = vrcp.f32 %v508_v19 }
 0x2ca   :  { %v505_v20 = vpop.f32.mrf.mxu3 }
 0x2cb   :  { %v1215_v21 = vpop.eup %1214  ;;  %v509_v22 = vmax.f32 %v505_v20, 1e-12 }
 0x2cc   :  { %514 = vrot.lane.b32.xlu1 %v1215_v21, %s1286_s3 }
 0x2cd   :  { %1216 = vrcp.f32 %v509_v22 }
 0x2d3   :  { %v1217_v23 = vpop.eup %1216 }
 0x2d4   :  { %516 = vrot.lane.b32.xlu2 %v1217_v23, %s1286_s3 }
 0x32e   :  { %v517_v27 = vpop.permute.xlu2 %516 }
 0x32f   :  { %v521_v28 = vmul.f32 %v517_v27, %v505_v20  ;;  %v558_v20 = vld [vmem:[%s1744_s15] sm:$0x1] }
 0x331   :  { %v523_v31 = vadd.f32 %v521_v28, %v1454_v60  ;;  %v1189_v28 = vld [vmem:[%s1745_s16] ss:$0 sm:$0xff]  ;;  %s1097_s16 = sld [smem:[#allocation3 + $0x1]] }
 0x33e   :  { %v515_v29 = vpop.permute.xlu1 %514 }
 0x33f   :  { %v520_v30 = vmul.f32 %v515_v29, %v502_v49 }
 0x341   :  { %v522_v32 = vadd.f32 %v520_v30, %v1452_v59 }
 0x343   :  { %v524_v0 = vpack.c.bf16 %v523_v31, %v522_v32 }
 0x345   :  { %1079 = vmatmul.msk.bf16.vlgmr.msra.gmra.mxu0 %vm126_vm4, %v524_v0 }
 0x3c2   :  { %v553_v35 = vpop.f32.mrf.mxu0 }
 0x3c3   :  { %v571_v36 = vmul.f32 %v553_v35, %v553_v35  ;;  %v561_v38 = vsel %vm560_vm15, %v553_v35, 0.0 }
 0x3c5   :  { %v573_v41 = vsel %vm560_vm15, %v571_v36, 0.0 }
 0x3ca   :  { %v555_v37 = vpop.f32.mrf.mxu0 }
 0x3cb   :  { %v562_v39 = vsel %vm560_vm15, %v555_v37, 0.0  ;;  %v572_v25 = vmul.f32 %v555_v37, %v555_v37 }
 0x3cc   :  { %v563_v40 = vadd.f32 %v562_v39, %v561_v38 }
 0x3cd   :  { %v574_v42 = vsel %vm560_vm15, %v572_v25, 0.0 }
 0x3ce   :  { %v564_v43 = vrot.slane %v563_v40, 4  ;;  %v575_v44 = vadd.f32 %v574_v42, %v573_v41 }
 0x3d0   :  { %v565_v45 = vadd.f32 %v564_v43, %v563_v40  ;;  %v576_v48 = vrot.slane %v575_v44, 4 }
 0x3d2   :  { %v566_v52 = vrot.slane %v565_v45, 2  ;;  %v577_v53 = vadd.f32 %v576_v48, %v575_v44 }
 0x3d4   :  { %v567_v55 = vadd.f32 %v566_v52, %v565_v45  ;;  %v578_v56 = vrot.slane %v577_v53, 2 }
 0x3d6   :  { %v568_v58 = vrot.slane %v567_v55, 1  ;;  %v579_v61 = vadd.f32 %v578_v56, %v577_v53 }
 0x3d8   :  { %v569_v5 = vadd.f32 %v568_v58, %v567_v55  ;;  %v580_v6 = vrot.slane %v579_v61, 1 }
 0x3da   :  { %v570_v7 = vmul.f32 %v569_v5, %v1442_v34  ;;  %v581_v8 = vadd.f32 %v580_v6, %v579_v61 }
 0x3dc   :  { %v582_v9 = vmul.f32 %v581_v8, %v1442_v34  ;;  %v583_v11 = vmul.f32 %v570_v7, %v570_v7  ;;  %v586_v24 = vsub.f32 %v553_v35, %v570_v7  ;;  %v587_v26 = vsub.f32 %v555_v37, %v570_v7  ;;  %v1190_v35 = vld [vmem:[%s1747_s18] ss:$0 sm:$0xff] }
 0x3de   :  { %v584_v12 = vsub.f32 %v582_v9, %v583_v11 }
 0x3e0   :  { %v585_v51 = vmax.f32 %v584_v12, 0.0 }
 0x3e2   :  { %v588_v14 = vadd.f32 1e-05, %v585_v51 }
 0x3e4   :  { %1218 = vrsqrt.f32 %v588_v14  ;;  %vm595_vm1 = vweird.f32 %v588_v14 }
 0x3ea   :  { %v1219_v15 = vpop.eup %1218 }
 0x3eb   :  { %v590_v16 = vmul.f32 %v1219_v15, %v588_v14  ;;  %vm596_vm0 = vweird.f32 %v1219_v15 }
 0x3ec   :  { %vm597_vm2 = vmor %vm595_vm1, %vm596_vm0 }
 0x3ed   :  { %v591_v18 = vmul.f32 %v1219_v15, %v590_v16 }
 0x3ef   :  { %v592_v49 = vmul.f32 0.5, %v591_v18 }
 0x3f1   :  { %v593_v19 = vsub.f32 1.5, %v592_v49 }
 0x3f3   :  { %v594_v21 = vmul.f32 %v1219_v15, %v593_v19 }
 0x3f5   :  { %v598_v22 = vsel %vm597_vm2, %v1219_v15, %v594_v21 }
 0x3f6   :  { %v599_v23 = vmul.f32 %v598_v22, %v558_v20 }
 0x3f8   :  { %v600_v27 = vperm.slane %v599_v23, 0 }
 0x3fa   :  { %v601_v29 = vmul.f32 %v600_v27, %v586_v24  ;;  %v602_v30 = vmul.f32 %v600_v27, %v587_v26 }
 0x3fc   :  { %v606_v31 = vadd.f32 %v1189_v28, %v601_v29  ;;  %v607_v32 = vadd.f32 %v1189_v28, %v602_v30 }
 0x3fe   :  { %v608_v0 = vmax.f32 %v606_v31, 0.0  ;;  %v609_v36 = vmax.f32 %v607_v32, 0.0 }
 0x400   :  { %v610_v38 = vpack.c.bf16 %v609_v36, %v608_v0 }
 0x402   :  { %1096 = vmatmul.msk.bf16.vlgmr.msra.gmra.mxu3 %vm560_vm15, %v610_v38 }
 0x485   :  { %v659_v39 = vpop.f32.mrf.mxu3 }
 0x486   :  { %v660_v37 = vadd.f32 %v1190_v35, %v659_v39 }
 0x488   :  { %v1628_v41 = vadd.f32 %v660_v37, %v1452_v59 }
 0x48d   :  { %v661_v25 = vpop.f32.mrf.mxu3 }
 0x48e   :  { %v662_v40 = vadd.f32 %v1190_v35, %v661_v25 }
 0x490   :  { %v1631_v42 = vadd.f32 %v662_v40, %v1454_v60 }
 0x492   :  { %v667_v43 = vpack.c.bf16 %v1631_v42, %v1628_v41 }
 0x494   :  { %675 = vmatpush.bf16.msrb.mxu0 %v667_v43 }
 0x497   :  { %1098 = vmatmul.msk.bf16.vlgmr.msrb.gmra.mxu0 %vm354_vm9, %v1461_v62 }
 0x4a7   :  { %1099 = vmatmul.msk.bf16.gmra.mxu0 %vm354_vm9, %v1468_v63 }
 0x4b7   :  { %1100 = vmatmul.msk.bf16.gmra.mxu0 %vm354_vm9, %v1479_v2 }
 0x514   :  { %v677_v44 = vpop.f32.mrf.mxu0 }
 0x515   :  { %v678_v60 = vadd.f32 %v677_v44, %v1533_v33 }
 0x517   :  { %v692_v57 = vmax.f32 %v678_v60, 0.0 }
 0x519   :  { %v1646_v46 = vadd.f32 1e-07, %v692_v57 }
 0x51c   :  { %v679_v45 = vpop.f32.mrf.mxu0 }
 0x51d   :  { %v680_v53 = vadd.f32 %v679_v45, %v1535_v1 }
 0x51f   :  { %v693_v58 = vmax.f32 %v680_v53, 0.0 }
 0x521   :  { %v1648_v7 = vadd.f32 1e-07, %v693_v58 }
 0x524   :  { %v682_v59 = vpop.f32.mrf.mxu0 }
 0x525   :  { %v683_v62 = vadd.f32 %v682_v59, %v1541_v3 }
 0x527   :  { %v694_v61 = vmax.f32 %v683_v62, 0.0 }
 0x529   :  { %v700_v8 = vadd.f32 1e-07, %v694_v61 }
 0x52c   :  { %v684_v48 = vpop.f32.mrf.mxu0 }
 0x52d   :  { %v685_v55 = vadd.f32 %v684_v48, %v1537_v4  ;;  %v704_v4 = vstv %s1097_s16  ;;  %s1024_s16 = sshll.u32 %s1753_s24, 4  ;;  %s1025_s16 = int_to_ptr.hbm [resolvable:$true] %s1024_s16 }
 0x52e   :  { %v705_v3 = vmul.f32 %v704_v4, %v1646_v46  ;;  %v706_v11 = vmul.f32 %v704_v4, %v1648_v7  ;;  %v707_v51 = vmul.f32 %v704_v4, %v700_v8 }
 0x52f   :  { %v695_v2 = vmax.f32 %v685_v55, 0.0 }
 0x530   :  { %v711_v15 = vsel %vm126_vm4, %v705_v3, -inf  ;;  %v712_v16 = vsel %vm126_vm4, %v706_v11, -inf  ;;  %v713_v20 = vsel %vm126_vm4, %v707_v51, -inf }
 0x531   :  { %v701_v33 = vadd.f32 1e-07, %v695_v2 }
 0x533   :  { %v708_v54 = vmul.f32 %v704_v4, %v701_v33 }
 0x534   :  { %v687_v52 = vpop.f32.mrf.mxu0 }
 0x535   :  { %v688_v56 = vadd.f32 %v687_v52, %v1539_v10 }
 0x537   :  { %v696_v63 = vmax.f32 %v688_v56, 0.0 }
 0x539   :  { %v702_v5 = vadd.f32 1e-07, %v696_v63 }
 0x53b   :  { %v709_v10 = vmul.f32 %v704_v4, %v702_v5 }
 0x53c   :  { %v689_v6 = vpop.f32.mrf.mxu0 }
 0x53d   :  { %v690_v1 = vadd.f32 %v689_v6, %v1548_v47  ;;  %v715_v13 = vsel %vm126_vm4, %v709_v10, -inf  ;;  %v714_v47 = vsel %vm126_vm4, %v708_v54, -inf }
 0x53e   :  { %v716_v49 = vmax.f32 %v711_v15, %v715_v13  ;;  %v720_v21 = vmax.f32 %v713_v20, %v714_v47 }
 0x53f   :  { %v697_v9 = vmax.f32 %v690_v1, 0.0 }
 0x541   :  { %v703_v12 = vadd.f32 1e-07, %v697_v9 }
 0x543   :  { %v710_v14 = vmul.f32 %v704_v4, %v703_v12 }
 0x545   :  { %v717_v18 = vsel %vm126_vm4, %v710_v14, -inf }
 0x546   :  { %v718_v19 = vmax.f32 %v712_v16, %v717_v18 }
 0x548   :  { %v719_v22 = vmax.f32 %v716_v49, %v718_v19  ;;  %v1144_v19 = vld [vmem:[%s1748_s19 + $0x8] sm:$0xff] }
 0x549   :  { %847 = vmatpush.bf16.msrb.mxu1 %v1144_v19  ;;  %v1287_v19 = vmov 0  }
 0x54a   :  { %v721_v23 = vmax.f32 %v719_v22, %v720_v21  ;;  %1186 = vset.pattern.permute.xlu0 %v1287_v19 }
 0x54c   :  { %v722_v24 = vrot.slane %v721_v23, 4 }
 0x54e   :  { %v723_v26 = vmax.f32 %v721_v23, %v722_v24 }
 0x550   :  { %v724_v27 = vrot.slane %v723_v26, 2 }
 0x552   :  { %v725_v28 = vmax.f32 %v723_v26, %v724_v27 }
 0x554   :  { %v726_v29 = vrot.slane %v725_v28, 1 }
 0x556   :  { %v727_v30 = vmax.f32 %v725_v28, %v726_v29 }
 0x558   :  { %v733_v31 = vsub.f32 %v710_v14, %v727_v30  ;;  %v732_v32 = vsub.f32 %v709_v10, %v727_v30  ;;  %v730_v0 = vsub.f32 %v707_v51, %v727_v30  ;;  %v731_v36 = vsub.f32 %v708_v54, %v727_v30 }
 0x559   :  { %v728_v38 = vsub.f32 %v705_v3, %v727_v30  ;;  %v729_v39 = vsub.f32 %v706_v11, %v727_v30 }
 0x55a   :  { %v744_v35 = vmul.f32 1.442695, %v733_v31  ;;  %v742_v37 = vmul.f32 1.442695, %v732_v32  ;;  %v738_v25 = vmul.f32 1.442695, %v730_v0 }
 0x55b   :  { %v740_v40 = vmul.f32 1.442695, %v731_v36  ;;  %v734_v43 = vmul.f32 1.442695, %v728_v38  ;;  %v736_v44 = vmul.f32 1.442695, %v729_v39 }
 0x55c   :  { %1220 = vpow2.f32 %v744_v35 }
 0x55d   :  { %1222 = vpow2.f32 %v742_v37 }
 0x55e   :  { %1224 = vpow2.f32 %v738_v25 }
 0x55f   :  { %1226 = vpow2.f32 %v740_v40 }
 0x560   :  { %1228 = vpow2.f32 %v734_v43 }
 0x561   :  { %1230 = vpow2.f32 %v736_v44  ;;  %v1148_v44 = vld [vmem:[%s1751_s22 + $0x18] sm:$0xff] }
 0x562   :  { %v1221_v45 = vpop.eup %1220  ;;  %950 = vmatpush.bf16.msrb.mxu2 %v1148_v44 }
 0x563   :  { %v1223_v59 = vpop.eup %1222  ;;  %v751_v48 = vmul.f32 %v1221_v45, %v703_v12 }
 0x564   :  { %v1225_v52 = vpop.eup %1224  ;;  %v1171_v60 = vpack.i.bf16 %v1223_v59, %v1221_v45  ;;  %v750_v53 = vmul.f32 %v1223_v59, %v702_v5 }
 0x565   :  { %v1227_v55 = vpop.eup %1226  ;;  %v748_v56 = vmul.f32 %v1225_v52, %v700_v8 }
 0x566   :  { %v1229_v62 = vpop.eup %1228  ;;  %1172 = vrot.lane.b32.xlu2 %v1171_v60, %s1285_s11  ;;  %v1176_v63 = vpack.i.bf16 %v1225_v52, %v1227_v55  ;;  %v749_v57 = vmul.f32 %v1227_v55, %v701_v33  ;;  %v1147_v60 = vld [vmem:[%s1751_s22 + $0x10] sm:$0xff] }
 0x567   :  { %v1231_v58 = vpop.eup %1230  ;;  %v746_v14 = vmul.f32 %v1229_v62, %v1646_v46  ;;  %951 = vmatpush.bf16.msrb.mxu2 %v1147_v60 }
 0x568   :  { %1177 = vrot.lane.b32.xlu0 %v1176_v63, %s1285_s11  ;;  %v1181_v2 = vpack.i.bf16 %v1229_v62, %v1231_v58  ;;  %v747_v51 = vmul.f32 %v1231_v58, %v1648_v7  ;;  %v1146_v63 = vld [vmem:[%s1751_s22 + $0x8] sm:$0xff] }
 0x56a   :  { %1182 = vrot.lane.b32.xlu1 %v1181_v2, %s1285_s11 }
 0x56b   :  { %952 = vmatpush.bf16.msrb.mxu2 %v1146_v63 }
 0x5c0   :  { %v1173_v61 = vpop.permute.xlu2 %1172 }
 0x5c1   :  { %v1175_v6 = vunpack.i.h.bf16 %v1173_v61  ;;  %v1174_v1 = vunpack.i.l.bf16 %v1173_v61  ;;  %v1145_v61 = vld [vmem:[%s1751_s22] sm:$0xff] }
 0x5c2   :  { %953 = vmatpush.bf16.msrb.mxu2 %v1145_v61 }
 0x5c3   :  { %v781_v4 = vsel %vm126_vm4, %v751_v48, %v1174_v1  ;;  %v780_v5 = vsel %vm126_vm4, %v750_v53, %v1175_v6 }
 0x5c4   :  { %792 = vmatpush.msrb.mxu3 %v781_v4 }
 0x5c6   :  { %793 = vmatpush.msrb.mxu3 %v780_v5 }
 0x5da   :  { %v1178_v8 = vpop.permute.xlu0 %1177 }
 0x5db   :  { %v1180_v10 = vunpack.i.h.bf16 %v1178_v8  ;;  %v1179_v9 = vunpack.i.l.bf16 %v1178_v8 }
 0x5dc   :  { %v1183_v3 = vpop.permute.xlu1 %1182 }
 0x5dd   :  { %v1184_v33 = vunpack.i.l.bf16 %v1183_v3  ;;  %v779_v11 = vsel %vm126_vm4, %v749_v57, %v1179_v9  ;;  %v1185_v54 = vunpack.i.h.bf16 %v1183_v3  ;;  %v778_v12 = vsel %vm126_vm4, %v748_v56, %v1180_v10 }
 0x5de   :  { %794 = vmatpush.msrb.mxu3 %v779_v11 }
 0x5df   :  { %v777_v13 = vsel %vm126_vm4, %v747_v51, %v1184_v33  ;;  %v776_v15 = vsel %vm126_vm4, %v746_v14, %v1185_v54 }
 0x5e0   :  { %795 = vmatpush.msrb.mxu3 %v778_v12 }
 0x5e2   :  { %796 = vmatpush.msrb.mxu3 %v777_v13  ;;  %v1191_v13 = vld [vmem:[%s1750_s21] ss:$0 sm:$0xff] }
 0x5e4   :  { %797 = vmatpush.msrb.mxu3 %v776_v15 }
 0x5e5   :  { %1101 = vmatmul.msk.f32.vlgmr.msrb.gmra.mxu3 %vm478_vm14, %v1576_v17  ;;  %v1143_v17 = vld [vmem:[%s1748_s19] sm:$0xff] }
 0x5e6   :  { %848 = vmatpush.bf16.msrb.mxu1 %v1143_v17  ;;  %v1192_v17 = vld [vmem:[%s1752_s23] ss:$0 sm:$0xff] }
 0x5ed   :  { %1102 = vmatmul.msk.f32.gmra.mxu3 %vm478_vm14, %v1584_v50 }
 0x668   :  { %v799_v16 = vpop.f32.mrf.mxu3 }
 0x669   :  { %v805_v47 = vmax.f32 %v799_v16, 1e-12 }
 0x66b   :  { %1232 = vrcp.f32 %v805_v47 }
 0x670   :  { %v802_v18 = vpop.f32.mrf.mxu3 }
 0x671   :  { %v1233_v7 = vpop.eup %1232  ;;  %v806_v49 = vmax.f32 %v802_v18, 1e-12 }
 0x672   :  { %811 = vrot.lane.b32.xlu2 %v1233_v7, %s1286_s3 }
 0x673   :  { %1234 = vrcp.f32 %v806_v49 }
 0x679   :  { %v1235_v46 = vpop.eup %1234 }
 0x67a   :  { %813 = vrot.lane.b32.xlu0 %v1235_v46, %s1286_s3  ;;  %v988_v46 = vld [vmem:[#allocation2] sm:$0x1] }
 0x682   :  { %991 = vperm.xlu0 %1186, %v988_v46  }
 0x6cc   :  { %v812_v50 = vpop.permute.xlu2 %811 }
 0x6cd   :  { %v817_v20 = vmul.f32 %v812_v50, %v799_v16 }
 0x6cf   :  { %v819_v23 = vadd.f32 %v817_v20, %v1628_v41 }
 0x6ec   :  { %v814_v21 = vpop.permute.xlu0 %813 }
 0x6ed   :  { %v818_v22 = vmul.f32 %v814_v21, %v802_v18  ;;  %v1193_v21 = vld [vmem:[%s1741_s12] ss:$0 sm:$0xff] }
 0x6ef   :  { %v820_v24 = vadd.f32 %v818_v22, %v1631_v42 }
 0x6f1   :  { %v821_v26 = vpack.c.bf16 %v820_v24, %v819_v23 }
 0x6f3   :  { %1111 = vmatmul.msk.bf16.vlgmr.msrb.gmra.mxu1 %vm126_vm4, %v821_v26 }
 0x770   :  { %v850_v27 = vpop.f32.mrf.mxu1 }
 0x771   :  { %v867_v28 = vmul.f32 %v850_v27, %v850_v27  ;;  %v857_v30 = vsel %vm560_vm15, %v850_v27, 0.0 }
 0x773   :  { %v869_v36 = vsel %vm560_vm15, %v867_v28, 0.0 }
 0x778   :  { %v852_v29 = vpop.f32.mrf.mxu1 }
 0x779   :  { %v858_v31 = vsel %vm560_vm15, %v852_v29, 0.0  ;;  %v868_v32 = vmul.f32 %v852_v29, %v852_v29 }
 0x77a   :  { %v859_v0 = vadd.f32 %v858_v31, %v857_v30  ;;  %v974_v31 = vld [vmem:[%s1775_s10] sm:$0xff] }
 0x77b   :  { %v870_v38 = vsel %vm560_vm15, %v868_v32, 0.0 }
 0x77c   :  { %v860_v39 = vrot.slane %v859_v0, 4  ;;  %v871_v35 = vadd.f32 %v870_v38, %v869_v36 }
 0x77e   :  { %v861_v37 = vadd.f32 %v860_v39, %v859_v0  ;;  %v872_v25 = vrot.slane %v871_v35, 4 }
 0x780   :  { %v862_v40 = vrot.slane %v861_v37, 2  ;;  %v873_v43 = vadd.f32 %v872_v25, %v871_v35 }
 0x782   :  { %v863_v45 = vadd.f32 %v862_v40, %v861_v37  ;;  %v874_v59 = vrot.slane %v873_v43, 2 }
 0x784   :  { %v864_v48 = vrot.slane %v863_v45, 1  ;;  %v875_v52 = vadd.f32 %v874_v59, %v873_v43  ;;  %v992_v43 = vpop.permute.xlu0 %991 }
 0x785   :  { %v994_v59 = vperm.slane %v992_v43, 0 }
 0x786   :  { %v865_v53 = vadd.f32 %v864_v48, %v863_v45  ;;  %v876_v55 = vrot.slane %v875_v52, 1 }
 0x788   :  { %v866_v56 = vmul.f32 %v865_v53, %v1442_v34  ;;  %v877_v62 = vadd.f32 %v876_v55, %v875_v52 }
 0x78a   :  { %v878_v57 = vmul.f32 %v877_v62, %v1442_v34  ;;  %v879_v58 = vmul.f32 %v866_v56, %v866_v56  ;;  %v855_v34 = vld [vmem:[%s1749_s20] sm:$0x1]  ;;  %v882_v54 = vsub.f32 %v850_v27, %v866_v56  ;;  %v883_v12 = vsub.f32 %v852_v29, %v866_v56 }
 0x78c   :  { %v880_v2 = vsub.f32 %v878_v57, %v879_v58 }
 0x78e   :  { %v881_v6 = vmax.f32 %v880_v2, 0.0 }
 0x790   :  { %v884_v1 = vadd.f32 1e-05, %v881_v6 }
 0x792   :  { %1236 = vrsqrt.f32 %v884_v1  ;;  %vm891_vm5 = vweird.f32 %v884_v1 }
 0x798   :  { %v1237_v4 = vpop.eup %1236 }
 0x799   :  { %v886_v5 = vmul.f32 %v1237_v4, %v884_v1  ;;  %vm892_vm3 = vweird.f32 %v1237_v4 }
 0x79a   :  { %vm893_vm6 = vmor %vm891_vm5, %vm892_vm3 }
 0x79b   :  { %v887_v8 = vmul.f32 %v1237_v4, %v886_v5 }
 0x79d   :  { %v888_v10 = vmul.f32 0.5, %v887_v8 }
 0x79f   :  { %v889_v9 = vsub.f32 1.5, %v888_v10 }
 0x7a1   :  { %v890_v3 = vmul.f32 %v1237_v4, %v889_v9 }
 0x7a3   :  { %v894_v33 = vsel %vm893_vm6, %v1237_v4, %v890_v3 }
 0x7a4   :  { %v895_v11 = vmul.f32 %v894_v33, %v855_v34 }
 0x7a6   :  { %v896_v51 = vperm.slane %v895_v11, 0 }
 0x7a8   :  { %v897_v14 = vmul.f32 %v896_v51, %v882_v54  ;;  %v898_v15 = vmul.f32 %v896_v51, %v883_v12 }
 0x7aa   :  { %v902_v16 = vadd.f32 %v1191_v13, %v897_v14  ;;  %v903_v47 = vadd.f32 %v1191_v13, %v898_v15 }
 0x7ac   :  { %v905_v18 = vmax.f32 %v903_v47, 0.0  ;;  %v904_v7 = vmax.f32 %v902_v16, 0.0 }
 0x7ae   :  { %v906_v49 = vpack.c.bf16 %v905_v18, %v904_v7 }
 0x7b0   :  { %1128 = vmatmul.msk.bf16.vlgmr.msrb.gmra.mxu2 %vm560_vm15, %v906_v49 }
 0x833   :  { %v955_v50 = vpop.f32.mrf.mxu2 }
 0x834   :  { %v956_v20 = vadd.f32 %v1192_v17, %v955_v50 }
 0x836   :  { %v960_v22 = vadd.f32 %v956_v20, %v1628_v41  ;;  %v975_v41 = vld [vmem:[%s1775_s10 + $0x8] sm:$0xff] }
 0x838   :  { %v966_v23 = vmul.f32 %v1193_v21, %v960_v22 }
 0x83a   :  { %v968_v24 = vsel %vm126_vm4, %v966_v23, 0.0 }
 0x83b   :  { %v957_v26 = vpop.f32.mrf.mxu2  ;;  %969 = vadd.xlane.f32.xlu1 %v968_v24 }
 0x83c   :  { %v958_v27 = vadd.f32 %v1192_v17, %v957_v26 }
 0x83e   :  { %v961_v28 = vadd.f32 %v958_v27, %v1631_v42 }
 0x840   :  { %v967_v29 = vmul.f32 %v1193_v21, %v961_v28 }
 0x842   :  { %v971_v30 = vsel %vm126_vm4, %v967_v29, 0.0 }
 0x843   :  { %972 = vadd.xlane.f32.xlu2 %v971_v30 }
 0x8ae   :  { %v970_v32 = vpop.xlane.xlu1 %969 }
 0x8af   :  { %v976_v0 = vmul.f32 %v974_v31, %v970_v32 }
 0x8b1   :  { %v979_v39 = vsel %vm978_vm7, %v976_v0, 0.0 }
 0x8b6   :  { %v973_v36 = vpop.xlane.xlu2 %972 }
 0x8b7   :  { %v977_v38 = vmul.f32 %v975_v41, %v973_v36 }
 0x8b9   :  { %v980_v35 = vsel %vm978_vm7, %v977_v38, 0.0 }
 0x8ba   :  { %v981_v42 = vadd.f32 %v980_v35, %v979_v39 }
 0x8bc   :  { %v982_v37 = vrot.slane %v981_v42, 4 }
 0x8be   :  { %v983_v25 = vadd.f32 %v982_v37, %v981_v42 }
 0x8c0   :  { %v984_v40 = vrot.slane %v983_v25, 2 }
 0x8c2   :  { %v985_v44 = vadd.f32 %v984_v40, %v983_v25 }
 0x8c4   :  { %v986_v45 = vrot.slane %v985_v44, 1 }
 0x8c6   :  { %v987_v48 = vadd.f32 %v986_v45, %v985_v44 }
 0x8c8   :  { %v995_v52 = vadd.f32 %v994_v59, %v987_v48 }
 0x8ca   :  { %v1129_v60 = vmul.f32 -1.442695, %v995_v52 }
 0x8cc   :  { %1238 = vpow2.f32 %v1129_v60 }
 0x8d2   :  { %v1239_v53 = vpop.eup %1238 }
 0x8d3   :  { %v999_v55 = vadd.f32 1.0, %v1239_v53 }
 0x8d5   :  { %1240 = vrcp.f32 %v999_v55  ;;  %v1011_v57 = vand.u32 2147483648, %v999_v55  ;;  %v1009_v2 = vand.u32 2147483647, %v999_v55  ;;  %vm1005_vm8 = vweird.f32 %v999_v55 }
 0x8d7   :  { %v1012_v6 = vor.u32 1.1754944e-38, %v1011_v57  ;;  %vm1010_vm11 = vcmp.eq.f32.partialorder %v1009_v2, 8.507059e+37 }
 0x8db   :  { %v1241_v56 = vpop.eup %1240 }
 0x8dc   :  { %v1001_v62 = vmul.f32 %v1241_v56, %v999_v55  ;;  %vm1006_vm4 = vweird.f32 %v1241_v56 }
 0x8dd   :  { %vm1007_vm9 = vmor %vm1005_vm8, %vm1006_vm4 }
 0x8de   :  { %v1002_v63 = vsub.f32 1.0, %v1001_v62 }
 0x8e0   :  { %v1003_v58 = vmul.f32 %v1241_v56, %v1002_v63 }
 0x8e2   :  { %v1004_v61 = vadd.f32 %v1241_v56, %v1003_v58 }
 0x8e4   :  { %v1008_v1 = vsel %vm1007_vm9, %v1241_v56, %v1004_v61 }
 0x8e5   :  { %v1013_v4 = vsel %vm1010_vm11, %v1012_v6, %v1008_v1 }
 0x8e6   :  { %1016 = vst.msk [vmem:[#allocation6] sm:$0x1] %vm1015_vm10, %v1013_v4 }
 0x8e7   :  { %1027 = dma.vmem_to_hbm [thread:$0]  %s1023_s0, 16, %s1025_s16, [#allocation4]  }
 0x8e8   :  { %1280 = dma.done.wait [#allocation4], 16  }
 0x8e9   :  { %1281 = vsyncadd [#allocation4], 4294967280 }
 0x8ea   :  { %1032 = vsyncpa [#allocation4], 1 }
 0x8eb   :  { %1033 = vsyncpa [#allocation5], 1 }

</bundles_post_ra>
